<compile_context>
chip_gen: v6e
topology: v6e:2x2x1
jax: 0.10.0
libtpu: 0.0.40
codegen_flags: <defaults>
</compile_context>

<pallas_src>
import numpy as np
import jax
import jax.numpy as jnp
from jax import lax
from jax.experimental import pallas as pl
from jax.experimental.pallas import tpu as pltpu


# ----------------------------- anchors (glue) -------------------------------
def generate_anchor_base(base_size=16, ratios=(0.5, 1.0, 2.0),
                         anchor_scales=(8, 16, 32)):
    py = base_size / 2.0
    px = base_size / 2.0
    ab = np.zeros((len(ratios) * len(anchor_scales), 4), dtype=np.float32)
    for i, r in enumerate(ratios):
        for j, s in enumerate(anchor_scales):
            h = base_size * s * np.sqrt(r)
            w = base_size * s * np.sqrt(1.0 / r)
            idx = i * len(anchor_scales) + j
            ab[idx, 0] = py - h / 2.0
            ab[idx, 1] = px - w / 2.0
            ab[idx, 2] = py + h / 2.0
            ab[idx, 3] = px + w / 2.0
    return ab


def enumerate_shifted_anchor(anchor_base, feat_stride, height, width):
    shift_y = jnp.arange(0, height * feat_stride, feat_stride, dtype=jnp.float32)
    shift_x = jnp.arange(0, width * feat_stride, feat_stride, dtype=jnp.float32)
    shift_x, shift_y = jnp.meshgrid(shift_x, shift_y)
    shift = jnp.stack((shift_y.ravel(), shift_x.ravel(),
                       shift_y.ravel(), shift_x.ravel()), axis=1)
    A = anchor_base.shape[0]
    K = shift.shape[0]
    anchor = anchor_base.reshape((1, A, 4)) + shift.reshape((K, 1, 4))
    return anchor.reshape((K * A, 4)).astype(jnp.float32)


# ----------------------------- helpers ---------------------------------------
def _round_up(x, m):
    return (x + m - 1) // m * m


def _tpu_vmem_capacity_bytes():
    """Physical VMEM of the attached TPU (fallback: assume the smallest, v7x)."""
    try:
        return int(pltpu.get_tpu_info().vmem_capacity_bytes)
    except Exception:
        return 64 * 1024 * 1024


def _pick_tile_h(H, W, max_rows):
    """Largest divisor t of H with t*W <= max_rows (output is 4-D so there is
    no rows%8 constraint); always >= 1, so a valid tiling always exists."""
    cands = [t for t in range(1, H + 1) if H % t == 0 and t * W <= max_rows]
    return max(cands) if cands else 1


# ----------------------------- Pallas kernel ---------------------------------
def rpn_pallas(x_nhwc, params, tile_h=None):
    """x_nhwc: (N, H, W, Cin) f32.
       params: (w1_3, b1, wh, bh):
         w1_3: (3, 3*Cin, Cmid)  bf16  3x3 conv weight, ky-major, kx folded
                                       into the channel (K) axis
         b1  : (1, Cmid)         f32
         wh  : (Cmid, Cpad)      bf16  fused [loc | score] head, lane-padded
         bh  : (1, Cpad)         f32
       Returns the fused head output, shape (N, H, W, Cpad), bf16."""
    N, H, W, Cin = x_nhwc.shape
    w1_3, b1, wh, bh = params
    Ck = w1_3.shape[1]
    Cmid = w1_3.shape[-1]
    Cpad = wh.shape[-1]
    assert Ck == 3 * Cin and Cpad % 128 == 0

    # Chip-aware tile / VMEM-limit selection (feedback: bigger tiles & limit
    # on 128-MiB-VMEM v5e/v6e, conservative on 64-MiB v7x).
    vmem_cap = _tpu_vmem_capacity_bytes()
    if vmem_cap >= 100 * 1024 * 1024:            # v5e / v6e (128 MiB VMEM)
        max_rows, vmem_limit = 2048, 96 * 1024 * 1024
    else:                                        # v7x (64 MiB VMEM)
        max_rows, vmem_limit = 1024, 48 * 1024 * 1024

    if tile_h is None:
        tile_h = _pick_tile_h(H, W, max_rows)
    assert H % tile_h == 0, "tile_h must divide H"
    n_row_tiles = H // tile_h
    rows = tile_h * W

    # Glue: zero-pad the 3x3 halo, cast to bf16 once, fold the kx taps into
    # the channel axis, then gather ky-halo'd row tiles so each grid step only
    # holds an O(tile) window in VMEM.
    xpad = jnp.pad(x_nhwc, ((0, 0), (1, 1), (1, 1), (0, 0))).astype(jnp.bfloat16)
    xk = jnp.concatenate([xpad[:, :, 0:W, :],
                          xpad[:, :, 1:W + 1, :],
                          xpad[:, :, 2:W + 2, :]], axis=-1)      # (N, H+2, W, 3Cin)
    xt = jnp.stack([xk[:, r * tile_h: r * tile_h + tile_h + 2]
                    for r in range(n_row_tiles)], axis=1)        # (N, R, th+2, W, 3Cin)

    def kernel(x_ref, w1_ref, b1_ref, wh_ref, bh_ref, out_ref):
        # x_ref: (tile_h+2, W, 3Cin) halo'd row tile (contiguous per-ky slice).
        # 3x3 conv == 3 ky-shifted (rows, 3Cin) @ (3Cin, Cmid) matmuls,
        # accumulated as a value (one result write, no f32 scratch RMW).
        acc = jnp.dot(x_ref[pl.ds(0, tile_h)].reshape(rows, Ck), w1_ref[0],
                      preferred_element_type=jnp.float32)
        for ky in (1, 2):
            acc = acc + jnp.dot(x_ref[pl.ds(ky, tile_h)].reshape(rows, Ck),
                                w1_ref[ky], preferred_element_type=jnp.float32)

        # Bias + ReLU in f32; fused loc|score head as one lane-dense matmul.
        h = jnp.maximum(acc + b1_ref[...], 0.0)
        out = jnp.dot(h.astype(wh_ref.dtype), wh_ref[...],
                      preferred_element_type=jnp.float32) + bh_ref[...]
        out_ref[...] = out.reshape(tile_h, W, Cpad).astype(out_ref.dtype)

    def build(single_buffer_weights):
        wkw = dict(pipeline_mode=pl.Buffered(1)) if single_buffer_weights else {}
        in_specs = [
            pl.BlockSpec((None, None, tile_h + 2, W, Ck),
                         lambda b, r: (b, r, 0, 0, 0)),
            pl.BlockSpec(w1_3.shape, lambda b, r: (0, 0, 0), **wkw),
            pl.BlockSpec(b1.shape, lambda b, r: (0, 0), **wkw),
            pl.BlockSpec(wh.shape, lambda b, r: (0, 0), **wkw),
            pl.BlockSpec(bh.shape, lambda b, r: (0, 0), **wkw),
        ]
        out_specs = pl.BlockSpec((None, tile_h, W, Cpad),
                                 lambda b, r: (b, r, 0, 0))
        # Shard the batch axis across TensorCores when N >= 2 (one image per
        # core); otherwise let the row axis be parallel.
        dims = (("parallel", "arbitrary") if N > 1 else ("parallel", "parallel"))
        return pl.pallas_call(
            kernel,
            out_shape=jax.ShapeDtypeStruct((N, H, W, Cpad), jnp.bfloat16),
            grid_spec=pltpu.PrefetchScalarGridSpec(
                num_scalar_prefetch=0,
                grid=(N, n_row_tiles),
                in_specs=in_specs,
                out_specs=out_specs,
            ),
            compiler_params=pltpu.CompilerParams(
                dimension_semantics=dims,
                vmem_limit_bytes=vmem_limit,
            ),
        )

    try:
        out = build(True)(xt, w1_3, b1, wh, bh)
    except Exception:
        # Fallback in case this JAX build rejects Buffered(1) on a BlockSpec.
        out = build(False)(xt, w1_3, b1, wh, bh)
    return out


# ----------------------------- forward (glue + kernel) -----------------------
def rpn_forward(x_nchw, img_size, params, anchor_base, feat_stride=16,
                scale=1.0, tile_h=None):
    n, _, hh, ww = x_nchw.shape
    A = anchor_base.shape[0]
    n_loc = 4 * A
    n_sc = 2 * A
    anchor = enumerate_shifted_anchor(jnp.asarray(anchor_base), feat_stride,
                                      hh, ww)
    x_nhwc = jnp.transpose(x_nchw, (0, 2, 3, 1))
    out = rpn_pallas(x_nhwc, params, tile_h=tile_h)        # (n, H, W, Cpad) bf16
    out = out.astype(jnp.float32)

    loc = out[..., :n_loc]                                 # (n, H, W, 4A)
    score = out[..., n_loc:n_loc + n_sc]                   # (n, H, W, 2A)
    rpn_locs = loc.reshape(n, hh * ww * A, 4)
    rpn_scores = score.reshape(n, hh * ww * A, 2)
    rpn_softmax_scores = jax.nn.softmax(score.reshape(n, hh, ww, A, 2), axis=4)
    rpn_fg_scores = rpn_softmax_scores[..., 1].reshape(n, -1)

    # TODO(synk): ProposalCreator (bbox decode + clip + score-sorted NMS with a
    # data-dependent number of proposals) has no clean Pallas equivalent;
    # rois / roi_indices are returned empty.
    rois = jnp.zeros((0, 4), jnp.float32)
    roi_indices = jnp.zeros((0,), jnp.int32)
    return rpn_locs, rpn_scores, rois, roi_indices, anchor, rpn_fg_scores


# ----------------------------- param conversion ------------------------------
def convert_params(w1_t, b1_t, wl_t, bl_t, ws_t, bs_t, lane_pad=128):
    """Convert PyTorch OIHW conv params to kernel layouts: ky-major bf16 conv
    weight with kx folded into K (3, 3*Cin, Cmid), and a single fused +
    lane-padded [loc | score] 1x1 head weight."""
    Cmid, Cin = w1_t.shape[0], w1_t.shape[1]
    # (Cmid, Cin, ky, kx) -> (ky, kx, Cin, Cmid) -> (ky, kx*Cin + c, Cmid)
    w1_3 = jnp.transpose(w1_t, (2, 3, 1, 0)).reshape(3, 3 * Cin, Cmid)
    w1_3 = w1_3.astype(jnp.bfloat16)
    b1 = b1_t.reshape(1, Cmid).astype(jnp.float32)
    wl = jnp.transpose(wl_t[:, :, 0, 0], (1, 0))           # (Cmid, 4A)
    ws = jnp.transpose(ws_t[:, :, 0, 0], (1, 0))           # (Cmid, 2A)
    c_out = wl.shape[1] + ws.shape[1]
    c_pad = _round_up(max(c_out, lane_pad), 128)
    wh = jnp.zeros((Cmid, c_pad), jnp.float32)
    wh = wh.at[:, :c_out].set(jnp.concatenate([wl, ws], axis=1))
    wh = wh.astype(jnp.bfloat16)
    bh = jnp.zeros((1, c_pad), jnp.float32)
    bh = bh.at[0, :c_out].set(jnp.concatenate([bl_t, bs_t], axis=0))
    return (w1_3, b1, wh, bh)


# ----------------------------- reference (for checking) ----------------------
def rpn_reference(x_nchw, torch_params):
    """Plain-JAX NCHW conv reference using the same bf16-operand / f32-accum
    numerics as the kernel (final bf16 output cast excluded)."""
    w1, b1, wl, bl, ws, bs = torch_params   # PyTorch OIHW layouts
    dn = ('NCHW', 'OIHW', 'NCHW')
    xb = x_nchw.astype(jnp.bfloat16)
    h = lax.conv_general_dilated(xb, w1.astype(jnp.bfloat16), (1, 1),
                                 ((1, 1), (1, 1)), dimension_numbers=dn,
                                 preferred_element_type=jnp.float32)
    h = jax.nn.relu(h + b1[None, :, None, None])
    hb = h.astype(jnp.bfloat16)
    loc = lax.conv_general_dilated(hb, wl.astype(jnp.bfloat16), (1, 1), 'VALID',
                                   dimension_numbers=dn,
                                   preferred_element_type=jnp.float32)
    loc = loc + bl[None, :, None, None]
    sc = lax.conv_general_dilated(hb, ws.astype(jnp.bfloat16), (1, 1), 'VALID',
                                  dimension_numbers=dn,
                                  preferred_element_type=jnp.float32)
    sc = sc + bs[None, :, None, None]
    n = x_nchw.shape[0]
    rpn_locs = jnp.transpose(loc, (0, 2, 3, 1)).reshape(n, -1, 4)
    rpn_scores = jnp.transpose(sc, (0, 2, 3, 1)).reshape(n, -1, 2)
    return rpn_locs, rpn_scores


# ----------------------------- main -------------------------------------------
if __name__ == "__main__":
    # Small synthetic shapes consistent with the module's forward.
    N, Cin, Cmid, H, W = 2, 4, 8, 16, 16
    feat_stride = 16
    anchor_base = generate_anchor_base(16, (0.5, 1.0, 2.0), (8, 16, 32))
    A = anchor_base.shape[0]                       # 9 anchors per location

    # Deterministic parameter init (normal_init: N(0, 0.01), zero bias).
    key = jax.random.PRNGKey(0)
    k1, k2, k3, kx = jax.random.split(key, 4)
    w1_t = 0.01 * jax.random.normal(k1, (Cmid, Cin, 3, 3), jnp.float32)
    b1_t = jnp.zeros((Cmid,), jnp.float32)
    wl_t = 0.01 * jax.random.normal(k2, (A * 4, Cmid, 1, 1), jnp.float32)
    bl_t = jnp.zeros((A * 4,), jnp.float32)
    ws_t = 0.01 * jax.random.normal(k3, (A * 2, Cmid, 1, 1), jnp.float32)
    bs_t = jnp.zeros((A * 2,), jnp.float32)

    params = convert_params(w1_t, b1_t, wl_t, bl_t, ws_t, bs_t)

    # Input features (N, C, H, W), same axis convention as the PyTorch module.
    x = jax.random.normal(kx, (N, Cin, H, W), jnp.float32)
    img_size = (H * feat_stride, W * feat_stride)

    # tile_h=8 -> grid (N=2, H/8=2): exercises halo handling across row tiles.
    outs = rpn_forward(x, img_size, params, anchor_base,
                       feat_stride=feat_stride, scale=1.0, tile_h=8)
    rpn_locs, rpn_scores, rois, roi_indices, anchor, rpn_fg = outs
    jax.block_until_ready((rpn_locs, rpn_scores, anchor, rpn_fg))

    # Correctness check against a plain-JAX NCHW conv reference (bf16-matched
    # operands; kernel additionally rounds its output to bf16, hence rtol).
    ref_locs, ref_scores = rpn_reference(x, (w1_t, b1_t, wl_t, bl_t, ws_t, bs_t))
    assert rpn_locs.shape == (N, H * W * A, 4)
    assert rpn_scores.shape == (N, H * W * A, 2)
    assert anchor.shape == (H * W * A, 4)
    np.testing.assert_allclose(np.asarray(rpn_locs), np.asarray(ref_locs),
                               rtol=2e-2, atol=3e-5)
    np.testing.assert_allclose(np.asarray(rpn_scores), np.asarray(ref_scores),
                               rtol=2e-2, atol=3e-5)

    print("KERNEL_OK")
</pallas_src>

<mosaic_0001>
module attributes {stable_mosaic.version = 11 : i64} {
  func.func @kernel(%arg0: i32, %arg1: i32, %arg2: memref<1x1x10x16x12xbf16, #tpu.memory_space<vmem>>, %arg3: memref<3x12x8xbf16, #tpu.memory_space<vmem>>, %arg4: memref<1x8xf32, #tpu.memory_space<vmem>>, %arg5: memref<8x128xbf16, #tpu.memory_space<vmem>>, %arg6: memref<1x128xf32, #tpu.memory_space<vmem>>, %arg7: memref<1x8x16x128xbf16, #tpu.memory_space<vmem>>) attributes {dimension_semantics = [#tpu.dimension_semantics<parallel>, #tpu.dimension_semantics<arbitrary>], iteration_bounds = array<i64: 2, 2>, scalar_prefetch = 0 : i64, scratch_operands = 0 : i64, tpu.core_type = #tpu.core_type<tc>, window_params = [{transform_indices = @transform_0, window_bounds = array<i64: 1, 1, 10, 16, 12>}, {pipeline_mode = #tpu.pipeline_mode<synchronous>, transform_indices = @transform_1, window_bounds = array<i64: 3, 12, 8>}, {pipeline_mode = #tpu.pipeline_mode<synchronous>, transform_indices = @transform_2, window_bounds = array<i64: 1, 8>}, {pipeline_mode = #tpu.pipeline_mode<synchronous>, transform_indices = @transform_3, window_bounds = array<i64: 8, 128>}, {pipeline_mode = #tpu.pipeline_mode<synchronous>, transform_indices = @transform_4, window_bounds = array<i64: 1, 128>}, {transform_indices = @transform_5, window_bounds = array<i64: 1, 8, 16, 128>}]} {
    %c0 = arith.constant 0 : index
    %c0_0 = arith.constant 0 : index
    %c0_1 = arith.constant 0 : index
    %c0_2 = arith.constant 0 : index
    %c0_3 = arith.constant 0 : index
    %0 = vector.load %arg2[%c0, %c0_0, %c0_1, %c0_2, %c0_3] : memref<1x1x10x16x12xbf16, #tpu.memory_space<vmem>>, vector<1x1x8x16x12xbf16>
    %1 = vector.shape_cast %0 : vector<1x1x8x16x12xbf16> to vector<8x16x12xbf16>
    %2 = vector.shape_cast %1 : vector<8x16x12xbf16> to vector<128x12xbf16>
    %c0_4 = arith.constant 0 : index
    %c0_5 = arith.constant 0 : index
    %c0_6 = arith.constant 0 : index
    %3 = vector.load %arg3[%c0_4, %c0_5, %c0_6] : memref<3x12x8xbf16, #tpu.memory_space<vmem>>, vector<1x12x8xbf16>
    %4 = vector.shape_cast %3 : vector<1x12x8xbf16> to vector<12x8xbf16>
    %cst = arith.constant dense<0.000000e+00> : vector<128x8xf32>
    %5 = tpu.matmul %2, %4, %cst {dimension_numbers = #tpu.dot_dimension_numbers<[1], [0], [0], [1], [0, 0, 1, 1], [], []>} : vector<128x12xbf16>, vector<12x8xbf16>, vector<128x8xf32> -> vector<128x8xf32>
    %c0_7 = arith.constant 0 : index
    %c0_8 = arith.constant 0 : index
    %c1 = arith.constant 1 : index
    %c0_9 = arith.constant 0 : index
    %c0_10 = arith.constant 0 : index
    %6 = vector.load %arg2[%c0_7, %c0_8, %c1, %c0_9, %c0_10] : memref<1x1x10x16x12xbf16, #tpu.memory_space<vmem>>, vector<1x1x8x16x12xbf16>
    %7 = vector.shape_cast %6 : vector<1x1x8x16x12xbf16> to vector<8x16x12xbf16>
    %8 = vector.shape_cast %7 : vector<8x16x12xbf16> to vector<128x12xbf16>
    %c1_11 = arith.constant 1 : index
    %c0_12 = arith.constant 0 : index
    %c0_13 = arith.constant 0 : index
    %9 = vector.load %arg3[%c1_11, %c0_12, %c0_13] : memref<3x12x8xbf16, #tpu.memory_space<vmem>>, vector<1x12x8xbf16>
    %10 = vector.shape_cast %9 : vector<1x12x8xbf16> to vector<12x8xbf16>
    %cst_14 = arith.constant dense<0.000000e+00> : vector<128x8xf32>
    %11 = tpu.matmul %8, %10, %cst_14 {dimension_numbers = #tpu.dot_dimension_numbers<[1], [0], [0], [1], [0, 0, 1, 1], [], []>} : vector<128x12xbf16>, vector<12x8xbf16>, vector<128x8xf32> -> vector<128x8xf32>
    %12 = arith.addf %5, %11 : vector<128x8xf32>
    %c0_15 = arith.constant 0 : index
    %c0_16 = arith.constant 0 : index
    %c2 = arith.constant 2 : index
    %c0_17 = arith.constant 0 : index
    %c0_18 = arith.constant 0 : index
    %13 = vector.load %arg2[%c0_15, %c0_16, %c2, %c0_17, %c0_18] : memref<1x1x10x16x12xbf16, #tpu.memory_space<vmem>>, vector<1x1x8x16x12xbf16>
    %14 = vector.shape_cast %13 : vector<1x1x8x16x12xbf16> to vector<8x16x12xbf16>
    %15 = vector.shape_cast %14 : vector<8x16x12xbf16> to vector<128x12xbf16>
    %c2_19 = arith.constant 2 : index
    %c0_20 = arith.constant 0 : index
    %c0_21 = arith.constant 0 : index
    %16 = vector.load %arg3[%c2_19, %c0_20, %c0_21] : memref<3x12x8xbf16, #tpu.memory_space<vmem>>, vector<1x12x8xbf16>
    %17 = vector.shape_cast %16 : vector<1x12x8xbf16> to vector<12x8xbf16>
    %cst_22 = arith.constant dense<0.000000e+00> : vector<128x8xf32>
    %18 = tpu.matmul %15, %17, %cst_22 {dimension_numbers = #tpu.dot_dimension_numbers<[1], [0], [0], [1], [0, 0, 1, 1], [], []>} : vector<128x12xbf16>, vector<12x8xbf16>, vector<128x8xf32> -> vector<128x8xf32>
    %19 = arith.addf %12, %18 : vector<128x8xf32>
    %c0_23 = arith.constant 0 : index
    %c0_24 = arith.constant 0 : index
    %20 = vector.load %arg4[%c0_23, %c0_24] : memref<1x8xf32, #tpu.memory_space<vmem>>, vector<1x8xf32>
    %21 = vector.broadcast %20 : vector<1x8xf32> to vector<128x8xf32>
    %22 = arith.addf %19, %21 : vector<128x8xf32>
    %cst_25 = arith.constant 0.000000e+00 : f32
    %23 = vector.broadcast %cst_25 : f32 to vector<128x8xf32>
    %24 = arith.maximumf %22, %23 : vector<128x8xf32>
    %25 = arith.truncf %24 : vector<128x8xf32> to vector<128x8xbf16>
    %c0_26 = arith.constant 0 : index
    %c0_27 = arith.constant 0 : index
    %26 = vector.load %arg5[%c0_26, %c0_27] : memref<8x128xbf16, #tpu.memory_space<vmem>>, vector<8x128xbf16>
    %cst_28 = arith.constant dense<0.000000e+00> : vector<128x128xf32>
    %27 = tpu.matmul %25, %26, %cst_28 {dimension_numbers = #tpu.dot_dimension_numbers<[1], [0], [0], [1], [0, 0, 1, 1], [], []>} : vector<128x8xbf16>, vector<8x128xbf16>, vector<128x128xf32> -> vector<128x128xf32>
    %c0_29 = arith.constant 0 : index
    %c0_30 = arith.constant 0 : index
    %28 = vector.load %arg6[%c0_29, %c0_30] : memref<1x128xf32, #tpu.memory_space<vmem>>, vector<1x128xf32>
    %29 = vector.broadcast %28 : vector<1x128xf32> to vector<128x128xf32>
    %30 = arith.addf %27, %29 : vector<128x128xf32>
    %31 = vector.shape_cast %30 : vector<128x128xf32> to vector<8x16x128xf32>
    %32 = arith.truncf %31 : vector<8x16x128xf32> to vector<8x16x128xbf16>
    %c0_31 = arith.constant 0 : index
    %c0_32 = arith.constant 0 : index
    %c0_33 = arith.constant 0 : index
    %c0_34 = arith.constant 0 : index
    %33 = vector.load %arg7[%c0_31, %c0_32, %c0_33, %c0_34] : memref<1x8x16x128xbf16, #tpu.memory_space<vmem>>, vector<1x8x16x128xbf16>
    %34 = vector.shape_cast %33 : vector<1x8x16x128xbf16> to vector<8x16x128xbf16>
    %35 = vector.shape_cast %32 : vector<8x16x128xbf16> to vector<1x8x16x128xbf16>
    tpu.vector_store %arg7[%c0_31, %c0_32, %c0_33, %c0_34], %35 {strides = array<i32>} : memref<1x8x16x128xbf16, #tpu.memory_space<vmem>>, vector<1x8x16x128xbf16>,
    return
  }
  func.func @transform_0(%arg0: i32, %arg1: i32) -> (i32, i32, i32, i32, i32) {
    %c0_i32 = arith.constant 0 : i32
    %c0_i32_0 = arith.constant 0 : i32
    %c0_i32_1 = arith.constant 0 : i32
    %c0_i32_2 = arith.constant 0 : i32
    return %arg0, %arg1, %c0_i32, %c0_i32_0, %c0_i32_1 : i32, i32, i32, i32, i32
  }
  func.func @transform_1(%arg0: i32, %arg1: i32) -> (i32, i32, i32) {
    %c0_i32 = arith.constant 0 : i32
    %c0_i32_0 = arith.constant 0 : i32
    %c0_i32_1 = arith.constant 0 : i32
    %c0_i32_2 = arith.constant 0 : i32
    return %c0_i32, %c0_i32_0, %c0_i32_1 : i32, i32, i32
  }
  func.func @transform_2(%arg0: i32, %arg1: i32) -> (i32, i32) {
    %c0_i32 = arith.constant 0 : i32
    %c0_i32_0 = arith.constant 0 : i32
    %c0_i32_1 = arith.constant 0 : i32
    return %c0_i32, %c0_i32_0 : i32, i32
  }
  func.func @transform_3(%arg0: i32, %arg1: i32) -> (i32, i32) {
    %c0_i32 = arith.constant 0 : i32
    %c0_i32_0 = arith.constant 0 : i32
    %c0_i32_1 = arith.constant 0 : i32
    return %c0_i32, %c0_i32_0 : i32, i32
  }
  func.func @transform_4(%arg0: i32, %arg1: i32) -> (i32, i32) {
    %c0_i32 = arith.constant 0 : i32
    %c0_i32_0 = arith.constant 0 : i32
    %c0_i32_1 = arith.constant 0 : i32
    return %c0_i32, %c0_i32_0 : i32, i32
  }
  func.func @transform_5(%arg0: i32, %arg1: i32) -> (i32, i32, i32, i32) {
    %c0_i32 = arith.constant 0 : i32
    %c0_i32_0 = arith.constant 0 : i32
    %c0_i32_1 = arith.constant 0 : i32
    return %arg0, %arg1, %c0_i32, %c0_i32_0 : i32, i32, i32, i32
  }
}

module attributes {stable_mosaic.version = 11 : i64} {
  func.func @kernel(%arg0: i32, %arg1: i32, %arg2: memref<1x1x10x16x12xbf16, #tpu.memory_space<vmem>>, %arg3: memref<3x12x8xbf16, #tpu.memory_space<vmem>>, %arg4: memref<1x8xf32, #tpu.memory_space<vmem>>, %arg5: memref<8x128xbf16, #tpu.memory_space<vmem>>, %arg6: memref<1x128xf32, #tpu.memory_space<vmem>>, %arg7: memref<1x8x16x128xbf16, #tpu.memory_space<vmem>>) attributes {dimension_semantics = [#tpu.dimension_semantics<parallel>, #tpu.dimension_semantics<arbitrary>], iteration_bounds = array<i64: 2, 2>, scalar_prefetch = 0 : i64, scratch_operands = 0 : i64, tpu.core_type = #tpu.core_type<tc>, window_params = [{transform_indices = @transform_0, window_bounds = array<i64: 1, 1, 10, 16, 12>}, {pipeline_mode = #tpu.pipeline_mode<synchronous>, transform_indices = @transform_1, window_bounds = array<i64: 3, 12, 8>}, {pipeline_mode = #tpu.pipeline_mode<synchronous>, transform_indices = @transform_2, window_bounds = array<i64: 1, 8>}, {pipeline_mode = #tpu.pipeline_mode<synchronous>, transform_indices = @transform_3, window_bounds = array<i64: 8, 128>}, {pipeline_mode = #tpu.pipeline_mode<synchronous>, transform_indices = @transform_4, window_bounds = array<i64: 1, 128>}, {transform_indices = @transform_5, window_bounds = array<i64: 1, 8, 16, 128>}]} {
    %c0 = arith.constant 0 : index
    %c0_0 = arith.constant 0 : index
    %c0_1 = arith.constant 0 : index
    %c0_2 = arith.constant 0 : index
    %c0_3 = arith.constant 0 : index
    %0 = vector.load %arg2[%c0, %c0_0, %c0_1, %c0_2, %c0_3] : memref<1x1x10x16x12xbf16, #tpu.memory_space<vmem>>, vector<1x1x8x16x12xbf16>
    %1 = vector.shape_cast %0 : vector<1x1x8x16x12xbf16> to vector<8x16x12xbf16>
    %2 = vector.shape_cast %1 : vector<8x16x12xbf16> to vector<128x12xbf16>
    %c0_4 = arith.constant 0 : index
    %c0_5 = arith.constant 0 : index
    %c0_6 = arith.constant 0 : index
    %3 = vector.load %arg3[%c0_4, %c0_5, %c0_6] : memref<3x12x8xbf16, #tpu.memory_space<vmem>>, vector<1x12x8xbf16>
    %4 = vector.shape_cast %3 : vector<1x12x8xbf16> to vector<12x8xbf16>
    %cst = arith.constant dense<0.000000e+00> : vector<128x8xf32>
    %5 = tpu.matmul %2, %4, %cst {dimension_numbers = #tpu.dot_dimension_numbers<[1], [0], [0], [1], [0, 0, 1, 1], [], []>} : vector<128x12xbf16>, vector<12x8xbf16>, vector<128x8xf32> -> vector<128x8xf32>
    %c0_7 = arith.constant 0 : index
    %c0_8 = arith.constant 0 : index
    %c1 = arith.constant 1 : index
    %c0_9 = arith.constant 0 : index
    %c0_10 = arith.constant 0 : index
    %6 = vector.load %arg2[%c0_7, %c0_8, %c1, %c0_9, %c0_10] : memref<1x1x10x16x12xbf16, #tpu.memory_space<vmem>>, vector<1x1x8x16x12xbf16>
    %7 = vector.shape_cast %6 : vector<1x1x8x16x12xbf16> to vector<8x16x12xbf16>
    %8 = vector.shape_cast %7 : vector<8x16x12xbf16> to vector<128x12xbf16>
    %c1_11 = arith.constant 1 : index
    %c0_12 = arith.constant 0 : index
    %c0_13 = arith.constant 0 : index
    %9 = vector.load %arg3[%c1_11, %c0_12, %c0_13] : memref<3x12x8xbf16, #tpu.memory_space<vmem>>, vector<1x12x8xbf16>
    %10 = vector.shape_cast %9 : vector<1x12x8xbf16> to vector<12x8xbf16>
    %cst_14 = arith.constant dense<0.000000e+00> : vector<128x8xf32>
    %11 = tpu.matmul %8, %10, %cst_14 {dimension_numbers = #tpu.dot_dimension_numbers<[1], [0], [0], [1], [0, 0, 1, 1], [], []>} : vector<128x12xbf16>, vector<12x8xbf16>, vector<128x8xf32> -> vector<128x8xf32>
    %12 = arith.addf %5, %11 : vector<128x8xf32>
    %c0_15 = arith.constant 0 : index
    %c0_16 = arith.constant 0 : index
    %c2 = arith.constant 2 : index
    %c0_17 = arith.constant 0 : index
    %c0_18 = arith.constant 0 : index
    %13 = vector.load %arg2[%c0_15, %c0_16, %c2, %c0_17, %c0_18] : memref<1x1x10x16x12xbf16, #tpu.memory_space<vmem>>, vector<1x1x8x16x12xbf16>
    %14 = vector.shape_cast %13 : vector<1x1x8x16x12xbf16> to vector<8x16x12xbf16>
    %15 = vector.shape_cast %14 : vector<8x16x12xbf16> to vector<128x12xbf16>
    %c2_19 = arith.constant 2 : index
    %c0_20 = arith.constant 0 : index
    %c0_21 = arith.constant 0 : index
    %16 = vector.load %arg3[%c2_19, %c0_20, %c0_21] : memref<3x12x8xbf16, #tpu.memory_space<vmem>>, vector<1x12x8xbf16>
    %17 = vector.shape_cast %16 : vector<1x12x8xbf16> to vector<12x8xbf16>
    %cst_22 = arith.constant dense<0.000000e+00> : vector<128x8xf32>
    %18 = tpu.matmul %15, %17, %cst_22 {dimension_numbers = #tpu.dot_dimension_numbers<[1], [0], [0], [1], [0, 0, 1, 1], [], []>} : vector<128x12xbf16>, vector<12x8xbf16>, vector<128x8xf32> -> vector<128x8xf32>
    %19 = arith.addf %12, %18 : vector<128x8xf32>
    %c0_23 = arith.constant 0 : index
    %c0_24 = arith.constant 0 : index
    %20 = vector.load %arg4[%c0_23, %c0_24] : memref<1x8xf32, #tpu.memory_space<vmem>>, vector<1x8xf32>
    %21 = vector.broadcast %20 : vector<1x8xf32> to vector<128x8xf32>
    %22 = arith.addf %19, %21 : vector<128x8xf32>
    %cst_25 = arith.constant 0.000000e+00 : f32
    %23 = vector.broadcast %cst_25 : f32 to vector<128x8xf32>
    %24 = arith.maximumf %22, %23 : vector<128x8xf32>
    %25 = arith.truncf %24 : vector<128x8xf32> to vector<128x8xbf16>
    %c0_26 = arith.constant 0 : index
    %c0_27 = arith.constant 0 : index
    %26 = vector.load %arg5[%c0_26, %c0_27] : memref<8x128xbf16, #tpu.memory_space<vmem>>, vector<8x128xbf16>
    %cst_28 = arith.constant dense<0.000000e+00> : vector<128x128xf32>
    %27 = tpu.matmul %25, %26, %cst_28 {dimension_numbers = #tpu.dot_dimension_numbers<[1], [0], [0], [1], [0, 0, 1, 1], [], []>} : vector<128x8xbf16>, vector<8x128xbf16>, vector<128x128xf32> -> vector<128x128xf32>
    %c0_29 = arith.constant 0 : index
    %c0_30 = arith.constant 0 : index
    %28 = vector.load %arg6[%c0_29, %c0_30] : memref<1x128xf32, #tpu.memory_space<vmem>>, vector<1x128xf32>
    %29 = vector.broadcast %28 : vector<1x128xf32> to vector<128x128xf32>
    %30 = arith.addf %27, %29 : vector<128x128xf32>
    %31 = vector.shape_cast %30 : vector<128x128xf32> to vector<8x16x128xf32>
    %32 = arith.truncf %31 : vector<8x16x128xf32> to vector<8x16x128xbf16>
    %c0_31 = arith.constant 0 : index
    %c0_32 = arith.constant 0 : index
    %c0_33 = arith.constant 0 : index
    %c0_34 = arith.constant 0 : index
    %33 = vector.load %arg7[%c0_31, %c0_32, %c0_33, %c0_34] : memref<1x8x16x128xbf16, #tpu.memory_space<vmem>>, vector<1x8x16x128xbf16>
    %34 = vector.shape_cast %33 : vector<1x8x16x128xbf16> to vector<8x16x128xbf16>
    %35 = vector.shape_cast %32 : vector<8x16x128xbf16> to vector<1x8x16x128xbf16>
    tpu.vector_store %arg7[%c0_31, %c0_32, %c0_33, %c0_34], %35 {strides = array<i32>} : memref<1x8x16x128xbf16, #tpu.memory_space<vmem>>, vector<1x8x16x128xbf16>,
    return
  }
  func.func @transform_0(%arg0: i32, %arg1: i32) -> (i32, i32, i32, i32, i32) {
    %c0_i32 = arith.constant 0 : i32
    %c0_i32_0 = arith.constant 0 : i32
    %c0_i32_1 = arith.constant 0 : i32
    %c0_i32_2 = arith.constant 0 : i32
    return %arg0, %arg1, %c0_i32, %c0_i32_0, %c0_i32_1 : i32, i32, i32, i32, i32
  }
  func.func @transform_1(%arg0: i32, %arg1: i32) -> (i32, i32, i32) {
    %c0_i32 = arith.constant 0 : i32
    %c0_i32_0 = arith.constant 0 : i32
    %c0_i32_1 = arith.constant 0 : i32
    %c0_i32_2 = arith.constant 0 : i32
    return %c0_i32, %c0_i32_0, %c0_i32_1 : i32, i32, i32
  }
  func.func @transform_2(%arg0: i32, %arg1: i32) -> (i32, i32) {
    %c0_i32 = arith.constant 0 : i32
    %c0_i32_0 = arith.constant 0 : i32
    %c0_i32_1 = arith.constant 0 : i32
    return %c0_i32, %c0_i32_0 : i32, i32
  }
  func.func @transform_3(%arg0: i32, %arg1: i32) -> (i32, i32) {
    %c0_i32 = arith.constant 0 : i32
    %c0_i32_0 = arith.constant 0 : i32
    %c0_i32_1 = arith.constant 0 : i32
    return %c0_i32, %c0_i32_0 : i32, i32
  }
  func.func @transform_4(%arg0: i32, %arg1: i32) -> (i32, i32) {
    %c0_i32 = arith.constant 0 : i32
    %c0_i32_0 = arith.constant 0 : i32
    %c0_i32_1 = arith.constant 0 : i32
    return %c0_i32, %c0_i32_0 : i32, i32
  }
  func.func @transform_5(%arg0: i32, %arg1: i32) -> (i32, i32, i32, i32) {
    %c0_i32 = arith.constant 0 : i32
    %c0_i32_0 = arith.constant 0 : i32
    %c0_i32_1 = arith.constant 0 : i32
    return %arg0, %arg1, %c0_i32, %c0_i32_0 : i32, i32, i32, i32
  }
}

</mosaic_0001>

<bundles_post_ra>
// kernel: tpu_custom_call.1
= control target key start
LH: loop header
LB: loop body
LE: loop exit
PB: predicated region body
PF: predicated region fallthrough
CT: control target
= control target key end

     0   :  { %10 = vsyncpa [#allocation3], 0  ;;  %s2000_s0 = inlined_call_operand.vmem [shape: bf16[2,2,10,16,12], index: 0, kind: input, shape index: {}]   ;;  %s2001_s1 = inlined_call_operand.vmem [shape: bf16[3,12,8], index: 1, kind: input, shape index: {}]   ;;  %s2002_s2 = inlined_call_operand.vmem [shape: f32[1,8], index: 2, kind: input, shape index: {}]   ;;  %s2003_s3 = inlined_call_operand.vmem [shape: bf16[8,128], index: 3, kind: input, shape index: {}]   ;;  %s2004_s4 = inlined_call_operand.vmem [shape: f32[1,128], index: 4, kind: input, shape index: {}]   ;;  %s2005_s5 = inlined_call_operand.hbm [shape: bf16[2,16,16,128], index: 5, kind: output, shape index: {}]  }
   0x1   :  { %12 = vsyncpa [#allocation3 + $0x1], 0  ;;  %s1731_s18 = smov 0   ;;  %s1733_s19 = smov 0  }
   0x2   :  { %s1735_s20 = smov 0   ;;  %s1737_s21 = smov 0  }
   0x3   :  { %s1739_s22 = smov 0   ;;  %s1741_s23 = smov 0  }
   0x4   :  { %s1743_s24 = smov 0   ;;  %s1745_s25 = smov 0  }
   0x5 LB: > { %s1199_s26 = sadd.s32 4294967295, %s1696_s25   ;;  %s1200_s27 = sadd.s32 4294967294, %s1696_s25   ;;  %s1696_s25 = sphi %s1745_s25, %s18_s25   ;;  %s1692_s24 = sphi %s1743_s24, %s2014_s24   ;;  %s1688_s23 = sphi %s1741_s23, %s2013_s23   ;;  %s1684_s22 = sphi %s1739_s22, %s2012_s22   ;;  %s1680_s21 = sphi %s1737_s21, %s2011_s21   ;;  %s1676_s20 = sphi %s1735_s20, %s2010_s20   ;;  %s1672_s19 = sphi %s1733_s19, %s2009_s19   ;;  %s1668_s18 = sphi %s1731_s18, %s2008_s18  }
   0x6   : > { %s27_s28 = sadd.s32 1, %s1688_s23  ;;  %s30_s29 = sadd.s32 1, %s1692_s24 }
   0x7   : > { %p28_p0 = scmp.ge.s32.totalorder %s27_s28, 2  ;;  %p161_p1 = scmp.ne.s32.totalorder %s1676_s20, %s1672_s19 }
   0x8   : > { %p162_p2 = scmp.eq.s32.totalorder %s1199_s26, 3  ;;  %p167_p5 = scmp.ne.s32.totalorder %s1672_s19, %s1668_s18 }
   0x9   : > { %s2016_s28 = smov (%p28_p0, %s27_s28), 0  ;;  %s2018_s29 = smov (!%p28_p0, %s30_s29), %s1692_s24 }
   0xa   : > { %s147_s30 = ssub.s32 %s1688_s23, %s2016_s28  ;;  %p1782_p3 = por %p162_p2, %p161_p1 }
   0xb   : > { %p32_p4 = scmp.ge.s32.totalorder %s2018_s29, 2  ;;  %p168_p6 = scmp.eq.s32.totalorder %s1200_s27, 3 }
   0xc   : > { %p1203_p7 = scmp.ge.s32.totalorder %s1696_s25, 1  ;;  %p210_p9 = scmp.lt.s32.totalorder %s1696_s25, 5 }
   0xd   : > { %s2020_s29 = smov (%p32_p4, %s2018_s29), 0  ;;  %p1791_p8 = por %p168_p6, %p167_p5 }
   0xe   : > { %s146_s8 = ssub.s32 %s1692_s24, %s2020_s29  ;;  %s151_s9 = sadd.s32 1, %s1676_s20 }
   0xf   : > { %s148_s10 = sor.u32 %s147_s30, %s146_s8  ;;  %p211_p10 = pnand %p1203_p7, %p210_p9 }
  0x10   : > { %p149_p11 = scmp.eq.s32.totalorder %s148_s10, 0  ;;  %p242_p12 = scmp.lt.s32.totalorder (!%p211_p10), %s1684_s22, 1 }
  0x11   : > { %214 = sbr.rel (%p211_p10) target bundleno = 513 (0x201), region = 40  ;;  %p244_p13 = scmp.lt.s32.totalorder (!%p211_p10), %s1680_s21, 1 }
  0x12   : > { %s1800_s11 = scalar_select %p149_p11, %s1676_s20, %s151_s9  }
  0x13   : > { %s239_s27 = sand.u32 (!%p211_p10), 1, %s1672_s19   ;;  %s1342_s12 = sshll.u32 (!%p211_p10), %s1680_s21, 4 }
  0x14   : > { %s1322_s13 = sshll.u32 (!%p211_p10), %s1684_s22, 5  ;;  %s1949_s26 = scalar_lea.sflag (!%p211_p10), [#allocation3], %s239_s27 }
  0x16   : > { %v1577_v0 = vld [vmem:[%s2001_s1 + $0x8] sm:$0x3f]   ;;  %vm361_vm0 = vcmask 1045504   ;;  %v1578_v2 = vld [vmem:[%s2001_s1] sm:$0x3f]   ;;  %s243_s16 = scalar_select %p242_p12, %s1684_s22, 1 }
  0x17   : > { %1498 = vmatprep.subr.msk.bf16.mxu0 %vm361_vm0, %v1577_v0  ;;  %v363_v1 = vsel %vm361_vm0, %v1577_v0, 0  ;;  %1499 = vmatprep.subr.msk.bf16.mxu1 %vm361_vm0, %v1578_v2  ;;  %v532_v3 = vsel %vm361_vm0, %v1578_v2, 0  ;;  %s245_s17 = scalar_select %p244_p13, %s1680_s21, 1  ;;  %v1581_v4 = vld [vmem:[%s2001_s1 + $0x10] sm:$0x3f]   ;;  %vm336_vm1 = vcmask 97280  }
  0x18   : > { %1427 = vmatpush3.bf16.msra.mxu0 %v363_v1  ;;  %1445 = vmatpush3.bf16.msra.mxu1 %v532_v3  ;;  %s1503_s30 = smul.u32 40, %s243_s16  ;;  %v721_v8 = vsel %vm361_vm0, %v1581_v4, 0  ;;  %v883_v30 = vld [vmem:[%s2003_s3] sm:$0xf]  ;;  %vm916_vm2 = vcmask 1043456   ;;  %vm891_vm3 = vcmask 64512  }
  0x19   : > { %s1502_s8 = smul.u32 20, %s245_s17  ;;  %1500 = vmatprep.subr.msk.bf16.mxu0 %vm361_vm0, %v1581_v4  ;;  %1501 = vmatprep.subr.msk.bf16.mxu1 %vm916_vm2, %v883_v30  ;;  %v918_v31 = vsel %vm916_vm2, %v883_v30, 0  ;;  %v1890_v3 = vld [vmem:[%s2002_s2] ss:$0 sm:$0xff] }
  0x1b   : > { %s248_s9 = sadd.s32 %s1503_s30, %s1502_s8  ;;  %s1698_s8 = smov [#allocation2]  }
  0x1c   : > { %s1205_s10 = sshll.u32 %s248_s9, 2  ;;  %s1204_s9 = sshll.u32 %s239_s27, 6 }
  0x1d   : > { %s1823_s14 = scalar_lea.vmem %s2000_s0, %s1205_s10  ;;  %s1927_s10 = scalar_lea.vmem [#allocation2], %s1204_s9 }
  0x1e   : > { %v1579_v5 = vld [vmem:[%s1823_s14 + $0x8] sm:$0xff]   ;;  %v1580_v6 = vld [vmem:[%s1823_s14] sm:$0xff]   ;;  %v1582_v7 = vld [vmem:[%s1823_s14 + $0x10] sm:$0xff]   ;;  %s1114_s16 = sshll.u32 %s1927_s10, 4  ;;  %s1608_s9 = sshll.u32 %s1698_s8, 4  ;;  %s1943_s16 = int_to_ptr.vmem [resolvable:$true] %s1114_s16  ;;  %s1609_s9 = int_to_ptr.vmem [resolvable:$false] %s1608_s9 }
  0x1f   : > { %1428 = vmatprep.mubr.msk.bf16.mxu0 %vm336_vm1, %v1579_v5  ;;  %1446 = vmatprep.mubr.msk.bf16.mxu1 %vm336_vm1, %v1580_v6  ;;  %v1583_v9 = vld [vmem:[%s1823_s14 + $0x8] sm:$0xff]   ;;  %v1584_v10 = vld [vmem:[%s1823_s14 + $0x18] sm:$0xff]   ;;  %v1585_v11 = vld [vmem:[%s1823_s14 + $0x10] sm:$0xff]   ;;  %s1604_s30 = scalar_lea.vmem %s1943_s16, 1024  ;;  %p1611_p4 = scmp.lt.s32.totalorder %s1943_s16, %s1609_s9 }
  0x20   : > { %1429 = vmatmul.mubr.msk.bf16.vlgmr.msra.gmra.mxu0 %vm336_vm1, %v1582_v7  ;;  %1447 = vmatmul.mubr.msk.bf16.vlgmr.msra.gmra.mxu1 %vm336_vm1, %v1583_v9  ;;  %v1586_v12 = vld [vmem:[%s1823_s14 + $0x20] sm:$0xff]   ;;  %v1587_v13 = vld [vmem:[%s1823_s14 + $0x18] sm:$0xff]   ;;  %v1588_v14 = vld [vmem:[%s1823_s14 + $0x28] sm:$0xff]   ;;  %p1605_p0 = scmp.ne.s32.totalorder %s1943_s16, %s1604_s30 }
  0x21   : > { %1463 = vmatpush3.bf16.msra.mxu0 %v721_v8  ;;  %1432 = vmatprep.mubr.msk.bf16.mxu0 %vm336_vm1, %v1584_v10  ;;  %v1589_v15 = vld [vmem:[%s1823_s14 + $0x20] sm:$0xff]   ;;  %v1590_v16 = vld [vmem:[%s1823_s14 + $0x30] sm:$0xff]   ;;  %v1591_v17 = vld [vmem:[%s1823_s14 + $0x28] sm:$0xff]  }
  0x22   : > { %1450 = vmatprep.mubr.msk.bf16.mxu1 %vm336_vm1, %v1585_v11  ;;  %v1592_v18 = vld [vmem:[%s1823_s14 + $0x38] sm:$0xff]   ;;  %v1593_v19 = vld [vmem:[%s1823_s14 + $0x30] sm:$0xff]   ;;  %v1594_v20 = vld [vmem:[%s1823_s14 + $0x40] sm:$0xff]   ;;  %1481 = vmatpush3.bf16.msra.mxu1 %v918_v31  ;;  %p1606_p1 = pnand %p1605_p0, %p1782_p3 }
  0x23   : > { %v1595_v21 = vld [vmem:[%s1823_s14 + $0x38] sm:$0xff]   ;;  %v1596_v22 = vld [vmem:[%s1823_s14 + $0x10] sm:$0xff]   ;;  %v1598_v24 = vld [vmem:[%s1823_s14 + $0x20] sm:$0xff]  }
  0x24   : > { %v1597_v23 = vld [vmem:[%s1823_s14 + $0x18] sm:$0xff]   ;;  %v1599_v25 = vld [vmem:[%s1823_s14 + $0x28] sm:$0xff]   ;;  %v1600_v26 = vld [vmem:[%s1823_s14 + $0x30] sm:$0xff]   ;;  %p1607_p2 = pneg %p1606_p1 }
  0x25   : > { %v1601_v27 = vld [vmem:[%s1823_s14 + $0x38] sm:$0xff]   ;;  %v1602_v28 = vld [vmem:[%s1823_s14 + $0x40] sm:$0xff]   ;;  %v1603_v29 = vld [vmem:[%s1823_s14 + $0x48] sm:$0xff]   ;;  %s1111_s14 = sadd.s32 %s1342_s12, %s1322_s13  ;;  %s1610_s12 = scalar_lea.vmem %s1609_s9, 2048 }
  0x26   : > { %s1323_s15 = sshll.u32 %s1111_s14, 6  ;;  %p1612_p5 = scmp.lt.s32.totalorder %s1610_s12, %s1604_s30 }
  0x27   : > { %s1941_s17 = scalar_lea.hbm %s2005_s5, %s1323_s15 }
  0x28   : > { %1433 = vmatmul.mubr.msk.bf16.gmra.mxu0 %vm336_vm1, %v1586_v12  ;;  %1451 = vmatmul.mubr.msk.bf16.gmra.mxu1 %vm336_vm1, %v1587_v13  ;;  %p1613_p6 = por %p1612_p5, %p1611_p4 }
  0x29   : > { %1436 = vmatprep.mubr.msk.bf16.mxu0 %vm336_vm1, %v1588_v14  ;;  %1454 = vmatprep.mubr.msk.bf16.mxu1 %vm336_vm1, %v1589_v15 }
  0x2a   : > { %p1614_p7 = pnand %p1613_p6, %p1607_p2 }
  0x30   : > { %1437 = vmatmul.mubr.msk.bf16.gmra.mxu0 %vm336_vm1, %v1590_v16  ;;  %1455 = vmatmul.mubr.msk.bf16.gmra.mxu1 %vm336_vm1, %v1591_v17 }
  0x31   : > { %1440 = vmatprep.mubr.msk.bf16.mxu0 %vm336_vm1, %v1592_v18  ;;  %1458 = vmatprep.mubr.msk.bf16.mxu1 %vm336_vm1, %v1593_v19 }
  0x38   : > { %1441 = vmatmul.mubr.msk.bf16.gmra.mxu0 %vm336_vm1, %v1594_v20  ;;  %1459 = vmatmul.mubr.msk.bf16.gmra.mxu1 %vm336_vm1, %v1595_v21 }
  0x39   : > { %1464 = vmatprep.mubr.msk.bf16.mxu0 %vm336_vm1, %v1596_v22 }
  0x40   : > { %1465 = vmatmul.mubr.msk.bf16.vlgmr.msra.gmra.mxu0 %vm336_vm1, %v1597_v23 }
  0x41   : > { %1468 = vmatprep.mubr.msk.bf16.mxu0 %vm336_vm1, %v1598_v24 }
  0x48   : > { %1469 = vmatmul.mubr.msk.bf16.gmra.mxu0 %vm336_vm1, %v1599_v25 }
  0x49   : > { %1472 = vmatprep.mubr.msk.bf16.mxu0 %vm336_vm1, %v1600_v26 }
  0x50   : > { %1473 = vmatmul.mubr.msk.bf16.gmra.mxu0 %vm336_vm1, %v1601_v27 }
  0x51   : > { %1476 = vmatprep.mubr.msk.bf16.mxu0 %vm336_vm1, %v1602_v28 }
  0x58   : > { %1477 = vmatmul.mubr.msk.bf16.gmra.mxu0 %vm336_vm1, %v1603_v29 }
  0xe0   : > { %v1430_v32 = vpop.f32.mrf.mxu0  ;;  %v1448_v33 = vpop.f32.mrf.mxu1 }
  0xe1   : > { %v577_v59 = vadd.f32 %v1448_v33, %v1430_v32 }
  0xe2   : > { %v399_v34 = vpop.f32.mrf.mxu0  ;;  %v568_v35 = vpop.f32.mrf.mxu1 }
  0xe3   : > { %v569_v58 = vadd.f32 %v568_v35, %v399_v34 }
  0xe4   : > { %v1431_v36 = vpop.f32.mrf.mxu0  ;;  %v1449_v37 = vpop.f32.mrf.mxu1 }
  0xe5   : > { %v580_v62 = vadd.f32 %v1449_v37, %v1431_v36 }
  0xe6   : > { %v402_v38 = vpop.f32.mrf.mxu0  ;;  %v571_v40 = vpop.f32.mrf.mxu1 }
  0xe7   : > { %v572_v2 = vadd.f32 %v571_v40, %v402_v38 }
  0xe8   : > { %v1434_v39 = vpop.f32.mrf.mxu0  ;;  %v1452_v43 = vpop.f32.mrf.mxu1 }
  0xe9   : > { %v593_v14 = vadd.f32 %v1452_v43, %v1434_v39 }
  0xea   : > { %v415_v41 = vpop.f32.mrf.mxu0  ;;  %v584_v46 = vpop.f32.mrf.mxu1 }
  0xeb   : > { %v585_v12 = vadd.f32 %v584_v46, %v415_v41 }
  0xec   : > { %v1435_v42 = vpop.f32.mrf.mxu0  ;;  %v1453_v49 = vpop.f32.mrf.mxu1 }
  0xed   : > { %v596_v18 = vadd.f32 %v1453_v49, %v1435_v42 }
  0xee   : > { %v418_v44 = vpop.f32.mrf.mxu0  ;;  %v587_v52 = vpop.f32.mrf.mxu1 }
  0xef   : > { %v588_v25 = vadd.f32 %v587_v52, %v418_v44 }
  0xf0   : > { %v1438_v45 = vpop.f32.mrf.mxu0  ;;  %v1456_v55 = vpop.f32.mrf.mxu1 }
  0xf1   : > { %v609_v38 = vadd.f32 %v1456_v55, %v1438_v45 }
  0xf2   : > { %v431_v47 = vpop.f32.mrf.mxu0  ;;  %v600_v60 = vpop.f32.mrf.mxu1 }
  0xf3   : > { %v601_v36 = vadd.f32 %v600_v60, %v431_v47 }
  0xf4   : > { %v1439_v48 = vpop.f32.mrf.mxu0  ;;  %v1457_v5 = vpop.f32.mrf.mxu1 }
  0xf5   : > { %v612_v42 = vadd.f32 %v1457_v5, %v1439_v48 }
  0xf6   : > { %v1877_v50 = vpop.f32.mrf.mxu0  ;;  %v603_v15 = vpop.f32.mrf.mxu1 }
  0xf8   : > { %v1879_v51 = vpop.f32.mrf.mxu0  ;;  %v1460_v28 = vpop.f32.mrf.mxu1 }
  0xfa   : > { %v1881_v53 = vpop.f32.mrf.mxu0  ;;  %v616_v39 = vpop.f32.mrf.mxu1 }
  0xfc   : > { %v1883_v54 = vpop.f32.mrf.mxu0 }
  0xfe   : > { %v1885_v56 = vpop.f32.mrf.mxu0 }
 0x100   : > { %v1466_v57 = vpop.f32.mrf.mxu0 }
 0x101   : > { %v822_v0 = vadd.f32 %v1466_v57, %v577_v59 }
 0x102   : > { %v757_v61 = vpop.f32.mrf.mxu0 }
 0x103   : > { %v820_v63 = vadd.f32 %v757_v61, %v569_v58  ;;  %v845_v10 = vadd.f32 %v1890_v3, %v822_v0  ;;  %v604_v58 = vadd.f32 %v603_v15, %v1877_v50 }
 0x104   : > { %v1467_v1 = vpop.f32.mrf.mxu0 }
 0x105   : > { %v823_v4 = vadd.f32 %v1467_v1, %v580_v62  ;;  %v843_v7 = vadd.f32 %v1890_v3, %v820_v63  ;;  %v861_v22 = vmax.f32 %v845_v10, 0.0  ;;  %v1461_v62 = vpop.f32.mrf.mxu1  ;;  %v617_v1 = vadd.f32 %v616_v39, %v1881_v53 }
 0x106   : > { %v760_v6 = vpop.f32.mrf.mxu0 }
 0x107   : > { %v846_v8 = vadd.f32 %v1890_v3, %v823_v4  ;;  %v821_v9 = vadd.f32 %v760_v6, %v572_v2  ;;  %v859_v19 = vmax.f32 %v843_v7, 0.0  ;;  %v625_v2 = vadd.f32 %v1460_v28, %v1879_v51  ;;  %v619_v4 = vpop.f32.mrf.mxu1 }
 0x108   : > { %v1470_v11 = vpop.f32.mrf.mxu0  ;;  %v628_v7 = vadd.f32 %v1461_v62, %v1883_v54 }
 0x109   : > { %v844_v13 = vadd.f32 %v1890_v3, %v821_v9  ;;  %v862_v16 = vmax.f32 %v846_v8, 0.0  ;;  %v826_v23 = vadd.f32 %v1470_v11, %v593_v14  ;;  %v620_v14 = vadd.f32 %v619_v4, %v1885_v56 }
 0x10a   : > { %v773_v17 = vpop.f32.mrf.mxu0 }
 0x10b   : > { %v860_v20 = vmax.f32 %v844_v13, 0.0  ;;  %v824_v21 = vadd.f32 %v773_v17, %v585_v12  ;;  %v876_v29 = vpack.c.bf16 %v862_v16, %v861_v22  ;;  %v849_v34 = vadd.f32 %v1890_v3, %v826_v23 }
 0x10c   : > { %v1471_v24 = vpop.f32.mrf.mxu0 }
 0x10d   : > { %v875_v26 = vpack.c.bf16 %v860_v20, %v859_v19  ;;  %v827_v27 = vadd.f32 %v1471_v24, %v596_v18  ;;  %v847_v31 = vadd.f32 %v1890_v3, %v824_v21  ;;  %v865_v49 = vmax.f32 %v849_v34, 0.0 }
 0x10e   : > { %v776_v30 = vpop.f32.mrf.mxu0 }
 0x10f   : > { %v850_v32 = vadd.f32 %v1890_v3, %v827_v27  ;;  %v825_v33 = vadd.f32 %v776_v30, %v588_v25  ;;  %1482 = vmatprep.mubr.msk.bf16.mxu1 %vm891_vm3, %v875_v26  ;;  %v863_v43 = vmax.f32 %v847_v31, 0.0  ;;  %v1294_v27 = vld [vmem:[%s2004_s4] ss:$0 sm:$0xff] }
 0x110   : > { %v1474_v35 = vpop.f32.mrf.mxu0  ;;  %1483 = vmatmul.mubr.msk.bf16.vlgmr.msra.gmra.mxu1 %vm891_vm3, %v876_v29 }
 0x111   : > { %v848_v37 = vadd.f32 %v1890_v3, %v825_v33  ;;  %v866_v40 = vmax.f32 %v850_v32, 0.0  ;;  %v830_v52 = vadd.f32 %v1474_v35, %v609_v38 }
 0x112   : > { %v789_v41 = vpop.f32.mrf.mxu0 }
 0x113   : > { %v864_v44 = vmax.f32 %v848_v37, 0.0  ;;  %v828_v46 = vadd.f32 %v789_v41, %v601_v36  ;;  %v878_v63 = vpack.c.bf16 %v866_v40, %v865_v49  ;;  %v853_v48 = vadd.f32 %v1890_v3, %v830_v52 }
 0x114   : > { %v1475_v57 = vpop.f32.mrf.mxu0 }
 0x115   : > { %v877_v59 = vpack.c.bf16 %v864_v44, %v863_v43  ;;  %v831_v61 = vadd.f32 %v1475_v57, %v612_v42  ;;  %v851_v60 = vadd.f32 %v1890_v3, %v828_v46  ;;  %v869_v11 = vmax.f32 %v853_v48, 0.0 }
 0x116   : > { %v792_v47 = vpop.f32.mrf.mxu0 }
 0x117   : > { %v854_v45 = vadd.f32 %v1890_v3, %v831_v61  ;;  %v829_v55 = vadd.f32 %v792_v47, %v604_v58  ;;  %1486 = vmatprep.mubr.msk.bf16.mxu1 %vm891_vm3, %v877_v59  ;;  %v867_v8 = vmax.f32 %v851_v60, 0.0 }
 0x118   : > { %v1478_v0 = vpop.f32.mrf.mxu0  ;;  %1487 = vmatmul.mubr.msk.bf16.gmra.mxu1 %vm891_vm3, %v878_v63 }
 0x119   : > { %v852_v50 = vadd.f32 %v1890_v3, %v829_v55  ;;  %v870_v5 = vmax.f32 %v854_v45, 0.0  ;;  %v834_v12 = vadd.f32 %v1478_v0, %v625_v2 }
 0x11a   : > { %v805_v6 = vpop.f32.mrf.mxu0 }
 0x11b   : > { %v868_v9 = vmax.f32 %v852_v50, 0.0  ;;  %v832_v10 = vadd.f32 %v805_v6, %v617_v1  ;;  %v880_v53 = vpack.c.bf16 %v870_v5, %v869_v11  ;;  %v857_v54 = vadd.f32 %v1890_v3, %v834_v12 }
 0x11c   : > { %v1479_v13 = vpop.f32.mrf.mxu0 }
 0x11d   : > { %v879_v15 = vpack.c.bf16 %v868_v9, %v867_v8  ;;  %v835_v16 = vadd.f32 %v1479_v13, %v628_v7  ;;  %v855_v18 = vadd.f32 %v1890_v3, %v832_v10  ;;  %v873_v23 = vmax.f32 %v857_v54, 0.0 }
 0x11e   : > { %v808_v17 = vpop.f32.mrf.mxu0 }
 0x11f   : > { %v858_v51 = vadd.f32 %v1890_v3, %v835_v16  ;;  %v833_v19 = vadd.f32 %v808_v17, %v620_v14  ;;  %1490 = vmatprep.mubr.msk.bf16.mxu1 %vm891_vm3, %v879_v15  ;;  %v871_v21 = vmax.f32 %v855_v18, 0.0 }
 0x120   : > { %1491 = vmatmul.mubr.msk.bf16.gmra.mxu1 %vm891_vm3, %v880_v53 }
 0x121   : > { %v856_v20 = vadd.f32 %v1890_v3, %v833_v19  ;;  %v874_v56 = vmax.f32 %v858_v51, 0.0 }
 0x123   : > { %v872_v22 = vmax.f32 %v856_v20, 0.0  ;;  %v882_v25 = vpack.c.bf16 %v874_v56, %v873_v23 }
 0x125   : > { %v881_v24 = vpack.c.bf16 %v872_v22, %v871_v21 }
 0x127   : > { %1494 = vmatprep.mubr.msk.bf16.mxu1 %vm891_vm3, %v881_v24 }
 0x128   : > { %1495 = vmatmul.mubr.msk.bf16.gmra.mxu1 %vm891_vm3, %v882_v25 }
 0x1d0   : > { %v1484_v26 = vpop.f32.mrf.mxu1 }
 0x1d1   : > { %v963_v29 = vadd.f32 %v1484_v26, %v1294_v27 }
 0x1d2   : > { %v954_v28 = vpop.f32.mrf.mxu1 }
 0x1d3   : > { %v955_v32 = vadd.f32 %v1294_v27, %v954_v28 }
 0x1d4   : > { %v1485_v3 = vpop.f32.mrf.mxu1 }
 0x1d5   : > { %v966_v30 = vadd.f32 %v1485_v3, %v1294_v27 }
 0x1d6   : > { %v957_v31 = vpop.f32.mrf.mxu1 }
 0x1d7   : > { %v1351_v33 = vpack.c.bf16 %v966_v30, %v963_v29  ;;  %v958_v34 = vadd.f32 %v1294_v27, %v957_v31 }
 0x1d8   : > { %v1488_v35 = vpop.f32.mrf.mxu1 }
 0x1d9   : > { %1383 = vst [vmem:[%s1927_s10 + $0x8] sm:$0xff] %v1351_v33   ;;  %v1346_v36 = vpack.c.bf16 %v958_v34, %v955_v32  ;;  %v979_v39 = vadd.f32 %v1488_v35, %v1294_v27 }
 0x1da   : > { %v970_v37 = vpop.f32.mrf.mxu1 }
 0x1db   : > { %1347 = vst [vmem:[%s1927_s10] sm:$0xff] %v1346_v36   ;;  %v971_v42 = vadd.f32 %v1294_v27, %v970_v37 }
 0x1dc   : > { %v1489_v38 = vpop.f32.mrf.mxu1 }
 0x1dd   : > { %v982_v40 = vadd.f32 %v1489_v38, %v1294_v27 }
 0x1de   : > { %v973_v41 = vpop.f32.mrf.mxu1 }
 0x1df   : > { %v1361_v43 = vpack.c.bf16 %v982_v40, %v979_v39  ;;  %v974_v44 = vadd.f32 %v1294_v27, %v973_v41 }
 0x1e0   : > { %v1492_v46 = vpop.f32.mrf.mxu1 }
 0x1e1   : > { %1385 = vst [vmem:[%s1927_s10 + $0x18] sm:$0xff] %v1361_v43   ;;  %v1356_v49 = vpack.c.bf16 %v974_v44, %v971_v42  ;;  %v995_v58 = vadd.f32 %v1492_v46, %v1294_v27 }
 0x1e2   : > { %v986_v52 = vpop.f32.mrf.mxu1 }
 0x1e3   : > { %1384 = vst [vmem:[%s1927_s10 + $0x10] sm:$0xff] %v1356_v49   ;;  %v987_v62 = vadd.f32 %v1294_v27, %v986_v52 }
 0x1e4   : > { %v1493_v57 = vpop.f32.mrf.mxu1 }
 0x1e5   : > { %v998_v59 = vadd.f32 %v1493_v57, %v1294_v27 }
 0x1e6   : > { %v989_v61 = vpop.f32.mrf.mxu1 }
 0x1e7   : > { %v1371_v63 = vpack.c.bf16 %v998_v59, %v995_v58  ;;  %v990_v47 = vadd.f32 %v1294_v27, %v989_v61 }
 0x1e8   : > { %v1496_v60 = vpop.f32.mrf.mxu1 }
 0x1e9   : > { %1387 = vst [vmem:[%s1927_s10 + $0x28] sm:$0xff] %v1371_v63   ;;  %v1366_v45 = vpack.c.bf16 %v990_v47, %v987_v62  ;;  %v1011_v0 = vadd.f32 %v1496_v60, %v1294_v27 }
 0x1ea   : > { %v1002_v55 = vpop.f32.mrf.mxu1 }
 0x1eb   : > { %1386 = vst [vmem:[%s1927_s10 + $0x20] sm:$0xff] %v1366_v45   ;;  %v1003_v2 = vadd.f32 %v1294_v27, %v1002_v55 }
 0x1ec   : > { %v1497_v48 = vpop.f32.mrf.mxu1 }
 0x1ed   : > { %v1014_v1 = vadd.f32 %v1497_v48, %v1294_v27 }
 0x1ee   : > { %v1005_v50 = vpop.f32.mrf.mxu1 }
 0x1ef   : > { %v1381_v4 = vpack.c.bf16 %v1014_v1, %v1011_v0  ;;  %v1006_v5 = vadd.f32 %v1294_v27, %v1005_v50 }
 0x1f1   : > { %1389 = vst [vmem:[%s1927_s10 + $0x38] sm:$0xff] %v1381_v4   ;;  %v1376_v6 = vpack.c.bf16 %v1006_v5, %v1003_v2 }
 0x1f3   : > { %1388 = vst [vmem:[%s1927_s10 + $0x30] sm:$0xff] %v1376_v6  }
 0x1f4   : > { %1617 = shalt.err (!%p1614_p7)
}
 0x1f5   : > { %s1618_s27 = scalar_lea.hbm %s1941_s17, 1024  ;;  %s1622_s14 = scalar_lea.hbm %s2005_s5, 4096 }
 0x1f6   : > { %p1619_p9 = scmp.ne.s32.totalorder %s1941_s17, %s1618_s27  ;;  %p1623_p12 = scmp.lt.s32.totalorder %s1941_s17, %s2005_s5 }
 0x1f7   : > { %p1624_p13 = scmp.lt.s32.totalorder %s1622_s14, %s1618_s27 }
 0x1f8   : > { %p1620_p10 = pnand %p1619_p9, %p1782_p3 }
 0x1f9   : > { %p1625_p0 = por %p1624_p13, %p1623_p12 }
 0x1fa   : > { %p1621_p11 = pneg %p1620_p10 }
 0x1fc   : > { %p1626_p1 = pnand %p1625_p0, %p1621_p11 }
 0x1fe   : > { %1629 = shalt.err (!%p1626_p1)
}
 0x1ff   : > { %s1699_s22 = smov 64   ;;  %s1700_s30 = smov 4  }
 0x200   : > { %1504 = dma.vmem_to_hbm [thread:$0]  (%p1782_p3), %s1943_s16, 1024, %s1941_s17, %s1949_s26, %s1699_s22, %s1699_s22, %s1700_s30  }
 0x201 PF: > { %p1510_p2 = scmp.ge.s32.totalorder %s1696_s25, 2  ;;  %s1129_s8 = sand.u32 1, %s1668_s18  }
 0x202   : > { %s1130_s9 = scalar_lea.sflag [#allocation3], %s1129_s8 }
 0x203   : > { %p1507_p4 = pnand %p1510_p2, %p1791_p8 }
 0x205   : > { %p1508_p5 = pneg %p1507_p4 }
 0x207   : > { %1663 = dma.done.wait (%p1508_p5), %s1130_s9, 1024  }
 0x208   : > { %1665 = vsyncadd (%p1508_p5), %s1130_s9, 4294966272  ;;  %s18_s25 = sadd.s32 1, %s1696_s25   ;;  %s2008_s18 = smov %s1672_s19 }
 0x209   : > { %p15_p6 = scmp.ge.s32.totalorder %s18_s25, 6   ;;  %s2009_s19 = smov %s1676_s20 }
 0x20a   : > { %s2010_s20 = smov %s1800_s11  ;;  %s2011_s21 = smov %s1688_s23 }
 0x20b   : > { %s2012_s22 = smov %s1692_s24  ;;  %s2013_s23 = smov %s2016_s28 }
 0x20c   : > { %s2014_s24 = smov %s2020_s29  ;;  %17 = sbr.rel (!%p15_p6) target bundleno = 5 (0x5), region = 79 }
 0x211   :  { %1135 = vsyncpa [#allocation3], 1 }
 0x212   :  { %1137 = vsyncpa [#allocation3 + $0x1], 1 }

// kernel: tpu_custom_call.1
= control target key start
LH: loop header
LB: loop body
LE: loop exit
PB: predicated region body
PF: predicated region fallthrough
CT: control target
= control target key end

     0   :  { %10 = vsyncpa [#allocation3], 0  ;;  %s2000_s0 = inlined_call_operand.vmem [shape: bf16[2,2,10,16,12], index: 0, kind: input, shape index: {}]   ;;  %s2001_s1 = inlined_call_operand.vmem [shape: bf16[3,12,8], index: 1, kind: input, shape index: {}]   ;;  %s2002_s2 = inlined_call_operand.vmem [shape: f32[1,8], index: 2, kind: input, shape index: {}]   ;;  %s2003_s3 = inlined_call_operand.vmem [shape: bf16[8,128], index: 3, kind: input, shape index: {}]   ;;  %s2004_s4 = inlined_call_operand.vmem [shape: f32[1,128], index: 4, kind: input, shape index: {}]   ;;  %s2005_s5 = inlined_call_operand.hbm [shape: bf16[2,16,16,128], index: 5, kind: output, shape index: {}]  }
   0x1   :  { %12 = vsyncpa [#allocation3 + $0x1], 0  ;;  %s1731_s18 = smov 0   ;;  %s1733_s19 = smov 0  }
   0x2   :  { %s1735_s20 = smov 0   ;;  %s1737_s21 = smov 0  }
   0x3   :  { %s1739_s22 = smov 0   ;;  %s1741_s23 = smov 0  }
   0x4   :  { %s1743_s24 = smov 0   ;;  %s1745_s25 = smov 0  }
   0x5 LB: > { %s1199_s26 = sadd.s32 4294967295, %s1696_s25   ;;  %s1200_s27 = sadd.s32 4294967294, %s1696_s25   ;;  %s1696_s25 = sphi %s1745_s25, %s18_s25   ;;  %s1692_s24 = sphi %s1743_s24, %s2014_s24   ;;  %s1688_s23 = sphi %s1741_s23, %s2013_s23   ;;  %s1684_s22 = sphi %s1739_s22, %s2012_s22   ;;  %s1680_s21 = sphi %s1737_s21, %s2011_s21   ;;  %s1676_s20 = sphi %s1735_s20, %s2010_s20   ;;  %s1672_s19 = sphi %s1733_s19, %s2009_s19   ;;  %s1668_s18 = sphi %s1731_s18, %s2008_s18  }
   0x6   : > { %s27_s28 = sadd.s32 1, %s1688_s23  ;;  %s30_s29 = sadd.s32 1, %s1692_s24 }
   0x7   : > { %p28_p0 = scmp.ge.s32.totalorder %s27_s28, 2  ;;  %p161_p1 = scmp.ne.s32.totalorder %s1676_s20, %s1672_s19 }
   0x8   : > { %p162_p2 = scmp.eq.s32.totalorder %s1199_s26, 3  ;;  %p167_p5 = scmp.ne.s32.totalorder %s1672_s19, %s1668_s18 }
   0x9   : > { %s2016_s28 = smov (%p28_p0, %s27_s28), 0  ;;  %s2018_s29 = smov (!%p28_p0, %s30_s29), %s1692_s24 }
   0xa   : > { %s147_s30 = ssub.s32 %s1688_s23, %s2016_s28  ;;  %p1782_p3 = por %p162_p2, %p161_p1 }
   0xb   : > { %p32_p4 = scmp.ge.s32.totalorder %s2018_s29, 2  ;;  %p168_p6 = scmp.eq.s32.totalorder %s1200_s27, 3 }
   0xc   : > { %p1203_p7 = scmp.ge.s32.totalorder %s1696_s25, 1  ;;  %p210_p9 = scmp.lt.s32.totalorder %s1696_s25, 5 }
   0xd   : > { %s2020_s29 = smov (%p32_p4, %s2018_s29), 0  ;;  %p1791_p8 = por %p168_p6, %p167_p5 }
   0xe   : > { %s146_s8 = ssub.s32 %s1692_s24, %s2020_s29  ;;  %s151_s9 = sadd.s32 1, %s1676_s20 }
   0xf   : > { %s148_s10 = sor.u32 %s147_s30, %s146_s8  ;;  %p211_p10 = pnand %p1203_p7, %p210_p9 }
  0x10   : > { %p149_p11 = scmp.eq.s32.totalorder %s148_s10, 0  ;;  %p242_p12 = scmp.lt.s32.totalorder (!%p211_p10), %s1684_s22, 1 }
  0x11   : > { %214 = sbr.rel (%p211_p10) target bundleno = 513 (0x201), region = 40  ;;  %p244_p13 = scmp.lt.s32.totalorder (!%p211_p10), %s1680_s21, 1 }
  0x12   : > { %s1800_s11 = scalar_select %p149_p11, %s1676_s20, %s151_s9  }
  0x13   : > { %s239_s27 = sand.u32 (!%p211_p10), 1, %s1672_s19   ;;  %s1342_s12 = sshll.u32 (!%p211_p10), %s1680_s21, 4 }
  0x14   : > { %s1322_s13 = sshll.u32 (!%p211_p10), %s1684_s22, 5  ;;  %s1949_s26 = scalar_lea.sflag (!%p211_p10), [#allocation3], %s239_s27 }
  0x16   : > { %v1577_v0 = vld [vmem:[%s2001_s1 + $0x8] sm:$0x3f]   ;;  %vm361_vm0 = vcmask 1045504   ;;  %v1578_v2 = vld [vmem:[%s2001_s1] sm:$0x3f]   ;;  %s243_s16 = scalar_select %p242_p12, %s1684_s22, 1 }
  0x17   : > { %1498 = vmatprep.subr.msk.bf16.mxu0 %vm361_vm0, %v1577_v0  ;;  %v363_v1 = vsel %vm361_vm0, %v1577_v0, 0  ;;  %1499 = vmatprep.subr.msk.bf16.mxu1 %vm361_vm0, %v1578_v2  ;;  %v532_v3 = vsel %vm361_vm0, %v1578_v2, 0  ;;  %s245_s17 = scalar_select %p244_p13, %s1680_s21, 1  ;;  %v1581_v4 = vld [vmem:[%s2001_s1 + $0x10] sm:$0x3f]   ;;  %vm336_vm1 = vcmask 97280  }
  0x18   : > { %1427 = vmatpush3.bf16.msra.mxu0 %v363_v1  ;;  %1445 = vmatpush3.bf16.msra.mxu1 %v532_v3  ;;  %s1503_s30 = smul.u32 40, %s243_s16  ;;  %v721_v8 = vsel %vm361_vm0, %v1581_v4, 0  ;;  %v883_v30 = vld [vmem:[%s2003_s3] sm:$0xf]  ;;  %vm916_vm2 = vcmask 1043456   ;;  %vm891_vm3 = vcmask 64512  }
  0x19   : > { %s1502_s8 = smul.u32 20, %s245_s17  ;;  %1500 = vmatprep.subr.msk.bf16.mxu0 %vm361_vm0, %v1581_v4  ;;  %1501 = vmatprep.subr.msk.bf16.mxu1 %vm916_vm2, %v883_v30  ;;  %v918_v31 = vsel %vm916_vm2, %v883_v30, 0  ;;  %v1890_v3 = vld [vmem:[%s2002_s2] ss:$0 sm:$0xff] }
  0x1b   : > { %s248_s9 = sadd.s32 %s1503_s30, %s1502_s8  ;;  %s1698_s8 = smov [#allocation2]  }
  0x1c   : > { %s1205_s10 = sshll.u32 %s248_s9, 2  ;;  %s1204_s9 = sshll.u32 %s239_s27, 6 }
  0x1d   : > { %s1823_s14 = scalar_lea.vmem %s2000_s0, %s1205_s10  ;;  %s1927_s10 = scalar_lea.vmem [#allocation2], %s1204_s9 }
  0x1e   : > { %v1579_v5 = vld [vmem:[%s1823_s14 + $0x8] sm:$0xff]   ;;  %v1580_v6 = vld [vmem:[%s1823_s14] sm:$0xff]   ;;  %v1582_v7 = vld [vmem:[%s1823_s14 + $0x10] sm:$0xff]   ;;  %s1114_s16 = sshll.u32 %s1927_s10, 4  ;;  %s1608_s9 = sshll.u32 %s1698_s8, 4  ;;  %s1943_s16 = int_to_ptr.vmem [resolvable:$true] %s1114_s16  ;;  %s1609_s9 = int_to_ptr.vmem [resolvable:$false] %s1608_s9 }
  0x1f   : > { %1428 = vmatprep.mubr.msk.bf16.mxu0 %vm336_vm1, %v1579_v5  ;;  %1446 = vmatprep.mubr.msk.bf16.mxu1 %vm336_vm1, %v1580_v6  ;;  %v1583_v9 = vld [vmem:[%s1823_s14 + $0x8] sm:$0xff]   ;;  %v1584_v10 = vld [vmem:[%s1823_s14 + $0x18] sm:$0xff]   ;;  %v1585_v11 = vld [vmem:[%s1823_s14 + $0x10] sm:$0xff]   ;;  %s1604_s30 = scalar_lea.vmem %s1943_s16, 1024  ;;  %p1611_p4 = scmp.lt.s32.totalorder %s1943_s16, %s1609_s9 }
  0x20   : > { %1429 = vmatmul.mubr.msk.bf16.vlgmr.msra.gmra.mxu0 %vm336_vm1, %v1582_v7  ;;  %1447 = vmatmul.mubr.msk.bf16.vlgmr.msra.gmra.mxu1 %vm336_vm1, %v1583_v9  ;;  %v1586_v12 = vld [vmem:[%s1823_s14 + $0x20] sm:$0xff]   ;;  %v1587_v13 = vld [vmem:[%s1823_s14 + $0x18] sm:$0xff]   ;;  %v1588_v14 = vld [vmem:[%s1823_s14 + $0x28] sm:$0xff]   ;;  %p1605_p0 = scmp.ne.s32.totalorder %s1943_s16, %s1604_s30 }
  0x21   : > { %1463 = vmatpush3.bf16.msra.mxu0 %v721_v8  ;;  %1432 = vmatprep.mubr.msk.bf16.mxu0 %vm336_vm1, %v1584_v10  ;;  %v1589_v15 = vld [vmem:[%s1823_s14 + $0x20] sm:$0xff]   ;;  %v1590_v16 = vld [vmem:[%s1823_s14 + $0x30] sm:$0xff]   ;;  %v1591_v17 = vld [vmem:[%s1823_s14 + $0x28] sm:$0xff]  }
  0x22   : > { %1450 = vmatprep.mubr.msk.bf16.mxu1 %vm336_vm1, %v1585_v11  ;;  %v1592_v18 = vld [vmem:[%s1823_s14 + $0x38] sm:$0xff]   ;;  %v1593_v19 = vld [vmem:[%s1823_s14 + $0x30] sm:$0xff]   ;;  %v1594_v20 = vld [vmem:[%s1823_s14 + $0x40] sm:$0xff]   ;;  %1481 = vmatpush3.bf16.msra.mxu1 %v918_v31  ;;  %p1606_p1 = pnand %p1605_p0, %p1782_p3 }
  0x23   : > { %v1595_v21 = vld [vmem:[%s1823_s14 + $0x38] sm:$0xff]   ;;  %v1596_v22 = vld [vmem:[%s1823_s14 + $0x10] sm:$0xff]   ;;  %v1598_v24 = vld [vmem:[%s1823_s14 + $0x20] sm:$0xff]  }
  0x24   : > { %v1597_v23 = vld [vmem:[%s1823_s14 + $0x18] sm:$0xff]   ;;  %v1599_v25 = vld [vmem:[%s1823_s14 + $0x28] sm:$0xff]   ;;  %v1600_v26 = vld [vmem:[%s1823_s14 + $0x30] sm:$0xff]   ;;  %p1607_p2 = pneg %p1606_p1 }
  0x25   : > { %v1601_v27 = vld [vmem:[%s1823_s14 + $0x38] sm:$0xff]   ;;  %v1602_v28 = vld [vmem:[%s1823_s14 + $0x40] sm:$0xff]   ;;  %v1603_v29 = vld [vmem:[%s1823_s14 + $0x48] sm:$0xff]   ;;  %s1111_s14 = sadd.s32 %s1342_s12, %s1322_s13  ;;  %s1610_s12 = scalar_lea.vmem %s1609_s9, 2048 }
  0x26   : > { %s1323_s15 = sshll.u32 %s1111_s14, 6  ;;  %p1612_p5 = scmp.lt.s32.totalorder %s1610_s12, %s1604_s30 }
  0x27   : > { %s1941_s17 = scalar_lea.hbm %s2005_s5, %s1323_s15 }
  0x28   : > { %1433 = vmatmul.mubr.msk.bf16.gmra.mxu0 %vm336_vm1, %v1586_v12  ;;  %1451 = vmatmul.mubr.msk.bf16.gmra.mxu1 %vm336_vm1, %v1587_v13  ;;  %p1613_p6 = por %p1612_p5, %p1611_p4 }
  0x29   : > { %1436 = vmatprep.mubr.msk.bf16.mxu0 %vm336_vm1, %v1588_v14  ;;  %1454 = vmatprep.mubr.msk.bf16.mxu1 %vm336_vm1, %v1589_v15 }
  0x2a   : > { %p1614_p7 = pnand %p1613_p6, %p1607_p2 }
  0x30   : > { %1437 = vmatmul.mubr.msk.bf16.gmra.mxu0 %vm336_vm1, %v1590_v16  ;;  %1455 = vmatmul.mubr.msk.bf16.gmra.mxu1 %vm336_vm1, %v1591_v17 }
  0x31   : > { %1440 = vmatprep.mubr.msk.bf16.mxu0 %vm336_vm1, %v1592_v18  ;;  %1458 = vmatprep.mubr.msk.bf16.mxu1 %vm336_vm1, %v1593_v19 }
  0x38   : > { %1441 = vmatmul.mubr.msk.bf16.gmra.mxu0 %vm336_vm1, %v1594_v20  ;;  %1459 = vmatmul.mubr.msk.bf16.gmra.mxu1 %vm336_vm1, %v1595_v21 }
  0x39   : > { %1464 = vmatprep.mubr.msk.bf16.mxu0 %vm336_vm1, %v1596_v22 }
  0x40   : > { %1465 = vmatmul.mubr.msk.bf16.vlgmr.msra.gmra.mxu0 %vm336_vm1, %v1597_v23 }
  0x41   : > { %1468 = vmatprep.mubr.msk.bf16.mxu0 %vm336_vm1, %v1598_v24 }
  0x48   : > { %1469 = vmatmul.mubr.msk.bf16.gmra.mxu0 %vm336_vm1, %v1599_v25 }
  0x49   : > { %1472 = vmatprep.mubr.msk.bf16.mxu0 %vm336_vm1, %v1600_v26 }
  0x50   : > { %1473 = vmatmul.mubr.msk.bf16.gmra.mxu0 %vm336_vm1, %v1601_v27 }
  0x51   : > { %1476 = vmatprep.mubr.msk.bf16.mxu0 %vm336_vm1, %v1602_v28 }
  0x58   : > { %1477 = vmatmul.mubr.msk.bf16.gmra.mxu0 %vm336_vm1, %v1603_v29 }
  0xe0   : > { %v1430_v32 = vpop.f32.mrf.mxu0  ;;  %v1448_v33 = vpop.f32.mrf.mxu1 }
  0xe1   : > { %v577_v59 = vadd.f32 %v1448_v33, %v1430_v32 }
  0xe2   : > { %v399_v34 = vpop.f32.mrf.mxu0  ;;  %v568_v35 = vpop.f32.mrf.mxu1 }
  0xe3   : > { %v569_v58 = vadd.f32 %v568_v35, %v399_v34 }
  0xe4   : > { %v1431_v36 = vpop.f32.mrf.mxu0  ;;  %v1449_v37 = vpop.f32.mrf.mxu1 }
  0xe5   : > { %v580_v62 = vadd.f32 %v1449_v37, %v1431_v36 }
  0xe6   : > { %v402_v38 = vpop.f32.mrf.mxu0  ;;  %v571_v40 = vpop.f32.mrf.mxu1 }
  0xe7   : > { %v572_v2 = vadd.f32 %v571_v40, %v402_v38 }
  0xe8   : > { %v1434_v39 = vpop.f32.mrf.mxu0  ;;  %v1452_v43 = vpop.f32.mrf.mxu1 }
  0xe9   : > { %v593_v14 = vadd.f32 %v1452_v43, %v1434_v39 }
  0xea   : > { %v415_v41 = vpop.f32.mrf.mxu0  ;;  %v584_v46 = vpop.f32.mrf.mxu1 }
  0xeb   : > { %v585_v12 = vadd.f32 %v584_v46, %v415_v41 }
  0xec   : > { %v1435_v42 = vpop.f32.mrf.mxu0  ;;  %v1453_v49 = vpop.f32.mrf.mxu1 }
  0xed   : > { %v596_v18 = vadd.f32 %v1453_v49, %v1435_v42 }
  0xee   : > { %v418_v44 = vpop.f32.mrf.mxu0  ;;  %v587_v52 = vpop.f32.mrf.mxu1 }
  0xef   : > { %v588_v25 = vadd.f32 %v587_v52, %v418_v44 }
  0xf0   : > { %v1438_v45 = vpop.f32.mrf.mxu0  ;;  %v1456_v55 = vpop.f32.mrf.mxu1 }
  0xf1   : > { %v609_v38 = vadd.f32 %v1456_v55, %v1438_v45 }
  0xf2   : > { %v431_v47 = vpop.f32.mrf.mxu0  ;;  %v600_v60 = vpop.f32.mrf.mxu1 }
  0xf3   : > { %v601_v36 = vadd.f32 %v600_v60, %v431_v47 }
  0xf4   : > { %v1439_v48 = vpop.f32.mrf.mxu0  ;;  %v1457_v5 = vpop.f32.mrf.mxu1 }
  0xf5   : > { %v612_v42 = vadd.f32 %v1457_v5, %v1439_v48 }
  0xf6   : > { %v1877_v50 = vpop.f32.mrf.mxu0  ;;  %v603_v15 = vpop.f32.mrf.mxu1 }
  0xf8   : > { %v1879_v51 = vpop.f32.mrf.mxu0  ;;  %v1460_v28 = vpop.f32.mrf.mxu1 }
  0xfa   : > { %v1881_v53 = vpop.f32.mrf.mxu0  ;;  %v616_v39 = vpop.f32.mrf.mxu1 }
  0xfc   : > { %v1883_v54 = vpop.f32.mrf.mxu0 }
  0xfe   : > { %v1885_v56 = vpop.f32.mrf.mxu0 }
 0x100   : > { %v1466_v57 = vpop.f32.mrf.mxu0 }
 0x101   : > { %v822_v0 = vadd.f32 %v1466_v57, %v577_v59 }
 0x102   : > { %v757_v61 = vpop.f32.mrf.mxu0 }
 0x103   : > { %v820_v63 = vadd.f32 %v757_v61, %v569_v58  ;;  %v845_v10 = vadd.f32 %v1890_v3, %v822_v0  ;;  %v604_v58 = vadd.f32 %v603_v15, %v1877_v50 }
 0x104   : > { %v1467_v1 = vpop.f32.mrf.mxu0 }
 0x105   : > { %v823_v4 = vadd.f32 %v1467_v1, %v580_v62  ;;  %v843_v7 = vadd.f32 %v1890_v3, %v820_v63  ;;  %v861_v22 = vmax.f32 %v845_v10, 0.0  ;;  %v1461_v62 = vpop.f32.mrf.mxu1  ;;  %v617_v1 = vadd.f32 %v616_v39, %v1881_v53 }
 0x106   : > { %v760_v6 = vpop.f32.mrf.mxu0 }
 0x107   : > { %v846_v8 = vadd.f32 %v1890_v3, %v823_v4  ;;  %v821_v9 = vadd.f32 %v760_v6, %v572_v2  ;;  %v859_v19 = vmax.f32 %v843_v7, 0.0  ;;  %v625_v2 = vadd.f32 %v1460_v28, %v1879_v51  ;;  %v619_v4 = vpop.f32.mrf.mxu1 }
 0x108   : > { %v1470_v11 = vpop.f32.mrf.mxu0  ;;  %v628_v7 = vadd.f32 %v1461_v62, %v1883_v54 }
 0x109   : > { %v844_v13 = vadd.f32 %v1890_v3, %v821_v9  ;;  %v862_v16 = vmax.f32 %v846_v8, 0.0  ;;  %v826_v23 = vadd.f32 %v1470_v11, %v593_v14  ;;  %v620_v14 = vadd.f32 %v619_v4, %v1885_v56 }
 0x10a   : > { %v773_v17 = vpop.f32.mrf.mxu0 }
 0x10b   : > { %v860_v20 = vmax.f32 %v844_v13, 0.0  ;;  %v824_v21 = vadd.f32 %v773_v17, %v585_v12  ;;  %v876_v29 = vpack.c.bf16 %v862_v16, %v861_v22  ;;  %v849_v34 = vadd.f32 %v1890_v3, %v826_v23 }
 0x10c   : > { %v1471_v24 = vpop.f32.mrf.mxu0 }
 0x10d   : > { %v875_v26 = vpack.c.bf16 %v860_v20, %v859_v19  ;;  %v827_v27 = vadd.f32 %v1471_v24, %v596_v18  ;;  %v847_v31 = vadd.f32 %v1890_v3, %v824_v21  ;;  %v865_v49 = vmax.f32 %v849_v34, 0.0 }
 0x10e   : > { %v776_v30 = vpop.f32.mrf.mxu0 }
 0x10f   : > { %v850_v32 = vadd.f32 %v1890_v3, %v827_v27  ;;  %v825_v33 = vadd.f32 %v776_v30, %v588_v25  ;;  %1482 = vmatprep.mubr.msk.bf16.mxu1 %vm891_vm3, %v875_v26  ;;  %v863_v43 = vmax.f32 %v847_v31, 0.0  ;;  %v1294_v27 = vld [vmem:[%s2004_s4] ss:$0 sm:$0xff] }
 0x110   : > { %v1474_v35 = vpop.f32.mrf.mxu0  ;;  %1483 = vmatmul.mubr.msk.bf16.vlgmr.msra.gmra.mxu1 %vm891_vm3, %v876_v29 }
 0x111   : > { %v848_v37 = vadd.f32 %v1890_v3, %v825_v33  ;;  %v866_v40 = vmax.f32 %v850_v32, 0.0  ;;  %v830_v52 = vadd.f32 %v1474_v35, %v609_v38 }
 0x112   : > { %v789_v41 = vpop.f32.mrf.mxu0 }
 0x113   : > { %v864_v44 = vmax.f32 %v848_v37, 0.0  ;;  %v828_v46 = vadd.f32 %v789_v41, %v601_v36  ;;  %v878_v63 = vpack.c.bf16 %v866_v40, %v865_v49  ;;  %v853_v48 = vadd.f32 %v1890_v3, %v830_v52 }
 0x114   : > { %v1475_v57 = vpop.f32.mrf.mxu0 }
 0x115   : > { %v877_v59 = vpack.c.bf16 %v864_v44, %v863_v43  ;;  %v831_v61 = vadd.f32 %v1475_v57, %v612_v42  ;;  %v851_v60 = vadd.f32 %v1890_v3, %v828_v46  ;;  %v869_v11 = vmax.f32 %v853_v48, 0.0 }
 0x116   : > { %v792_v47 = vpop.f32.mrf.mxu0 }
 0x117   : > { %v854_v45 = vadd.f32 %v1890_v3, %v831_v61  ;;  %v829_v55 = vadd.f32 %v792_v47, %v604_v58  ;;  %1486 = vmatprep.mubr.msk.bf16.mxu1 %vm891_vm3, %v877_v59  ;;  %v867_v8 = vmax.f32 %v851_v60, 0.0 }
 0x118   : > { %v1478_v0 = vpop.f32.mrf.mxu0  ;;  %1487 = vmatmul.mubr.msk.bf16.gmra.mxu1 %vm891_vm3, %v878_v63 }
 0x119   : > { %v852_v50 = vadd.f32 %v1890_v3, %v829_v55  ;;  %v870_v5 = vmax.f32 %v854_v45, 0.0  ;;  %v834_v12 = vadd.f32 %v1478_v0, %v625_v2 }
 0x11a   : > { %v805_v6 = vpop.f32.mrf.mxu0 }
 0x11b   : > { %v868_v9 = vmax.f32 %v852_v50, 0.0  ;;  %v832_v10 = vadd.f32 %v805_v6, %v617_v1  ;;  %v880_v53 = vpack.c.bf16 %v870_v5, %v869_v11  ;;  %v857_v54 = vadd.f32 %v1890_v3, %v834_v12 }
 0x11c   : > { %v1479_v13 = vpop.f32.mrf.mxu0 }
 0x11d   : > { %v879_v15 = vpack.c.bf16 %v868_v9, %v867_v8  ;;  %v835_v16 = vadd.f32 %v1479_v13, %v628_v7  ;;  %v855_v18 = vadd.f32 %v1890_v3, %v832_v10  ;;  %v873_v23 = vmax.f32 %v857_v54, 0.0 }
 0x11e   : > { %v808_v17 = vpop.f32.mrf.mxu0 }
 0x11f   : > { %v858_v51 = vadd.f32 %v1890_v3, %v835_v16  ;;  %v833_v19 = vadd.f32 %v808_v17, %v620_v14  ;;  %1490 = vmatprep.mubr.msk.bf16.mxu1 %vm891_vm3, %v879_v15  ;;  %v871_v21 = vmax.f32 %v855_v18, 0.0 }
 0x120   : > { %1491 = vmatmul.mubr.msk.bf16.gmra.mxu1 %vm891_vm3, %v880_v53 }
 0x121   : > { %v856_v20 = vadd.f32 %v1890_v3, %v833_v19  ;;  %v874_v56 = vmax.f32 %v858_v51, 0.0 }
 0x123   : > { %v872_v22 = vmax.f32 %v856_v20, 0.0  ;;  %v882_v25 = vpack.c.bf16 %v874_v56, %v873_v23 }
 0x125   : > { %v881_v24 = vpack.c.bf16 %v872_v22, %v871_v21 }
 0x127   : > { %1494 = vmatprep.mubr.msk.bf16.mxu1 %vm891_vm3, %v881_v24 }
 0x128   : > { %1495 = vmatmul.mubr.msk.bf16.gmra.mxu1 %vm891_vm3, %v882_v25 }
 0x1d0   : > { %v1484_v26 = vpop.f32.mrf.mxu1 }
 0x1d1   : > { %v963_v29 = vadd.f32 %v1484_v26, %v1294_v27 }
 0x1d2   : > { %v954_v28 = vpop.f32.mrf.mxu1 }
 0x1d3   : > { %v955_v32 = vadd.f32 %v1294_v27, %v954_v28 }
 0x1d4   : > { %v1485_v3 = vpop.f32.mrf.mxu1 }
 0x1d5   : > { %v966_v30 = vadd.f32 %v1485_v3, %v1294_v27 }
 0x1d6   : > { %v957_v31 = vpop.f32.mrf.mxu1 }
 0x1d7   : > { %v1351_v33 = vpack.c.bf16 %v966_v30, %v963_v29  ;;  %v958_v34 = vadd.f32 %v1294_v27, %v957_v31 }
 0x1d8   : > { %v1488_v35 = vpop.f32.mrf.mxu1 }
 0x1d9   : > { %1383 = vst [vmem:[%s1927_s10 + $0x8] sm:$0xff] %v1351_v33   ;;  %v1346_v36 = vpack.c.bf16 %v958_v34, %v955_v32  ;;  %v979_v39 = vadd.f32 %v1488_v35, %v1294_v27 }
 0x1da   : > { %v970_v37 = vpop.f32.mrf.mxu1 }
 0x1db   : > { %1347 = vst [vmem:[%s1927_s10] sm:$0xff] %v1346_v36   ;;  %v971_v42 = vadd.f32 %v1294_v27, %v970_v37 }
 0x1dc   : > { %v1489_v38 = vpop.f32.mrf.mxu1 }
 0x1dd   : > { %v982_v40 = vadd.f32 %v1489_v38, %v1294_v27 }
 0x1de   : > { %v973_v41 = vpop.f32.mrf.mxu1 }
 0x1df   : > { %v1361_v43 = vpack.c.bf16 %v982_v40, %v979_v39  ;;  %v974_v44 = vadd.f32 %v1294_v27, %v973_v41 }
 0x1e0   : > { %v1492_v46 = vpop.f32.mrf.mxu1 }
 0x1e1   : > { %1385 = vst [vmem:[%s1927_s10 + $0x18] sm:$0xff] %v1361_v43   ;;  %v1356_v49 = vpack.c.bf16 %v974_v44, %v971_v42  ;;  %v995_v58 = vadd.f32 %v1492_v46, %v1294_v27 }
 0x1e2   : > { %v986_v52 = vpop.f32.mrf.mxu1 }
 0x1e3   : > { %1384 = vst [vmem:[%s1927_s10 + $0x10] sm:$0xff] %v1356_v49   ;;  %v987_v62 = vadd.f32 %v1294_v27, %v986_v52 }
 0x1e4   : > { %v1493_v57 = vpop.f32.mrf.mxu1 }
 0x1e5   : > { %v998_v59 = vadd.f32 %v1493_v57, %v1294_v27 }
 0x1e6   : > { %v989_v61 = vpop.f32.mrf.mxu1 }
 0x1e7   : > { %v1371_v63 = vpack.c.bf16 %v998_v59, %v995_v58  ;;  %v990_v47 = vadd.f32 %v1294_v27, %v989_v61 }
 0x1e8   : > { %v1496_v60 = vpop.f32.mrf.mxu1 }
 0x1e9   : > { %1387 = vst [vmem:[%s1927_s10 + $0x28] sm:$0xff] %v1371_v63   ;;  %v1366_v45 = vpack.c.bf16 %v990_v47, %v987_v62  ;;  %v1011_v0 = vadd.f32 %v1496_v60, %v1294_v27 }
 0x1ea   : > { %v1002_v55 = vpop.f32.mrf.mxu1 }
 0x1eb   : > { %1386 = vst [vmem:[%s1927_s10 + $0x20] sm:$0xff] %v1366_v45   ;;  %v1003_v2 = vadd.f32 %v1294_v27, %v1002_v55 }
 0x1ec   : > { %v1497_v48 = vpop.f32.mrf.mxu1 }
 0x1ed   : > { %v1014_v1 = vadd.f32 %v1497_v48, %v1294_v27 }
 0x1ee   : > { %v1005_v50 = vpop.f32.mrf.mxu1 }
 0x1ef   : > { %v1381_v4 = vpack.c.bf16 %v1014_v1, %v1011_v0  ;;  %v1006_v5 = vadd.f32 %v1294_v27, %v1005_v50 }
 0x1f1   : > { %1389 = vst [vmem:[%s1927_s10 + $0x38] sm:$0xff] %v1381_v4   ;;  %v1376_v6 = vpack.c.bf16 %v1006_v5, %v1003_v2 }
 0x1f3   : > { %1388 = vst [vmem:[%s1927_s10 + $0x30] sm:$0xff] %v1376_v6  }
 0x1f4   : > { %1617 = shalt.err (!%p1614_p7)
}
 0x1f5   : > { %s1618_s27 = scalar_lea.hbm %s1941_s17, 1024  ;;  %s1622_s14 = scalar_lea.hbm %s2005_s5, 4096 }
 0x1f6   : > { %p1619_p9 = scmp.ne.s32.totalorder %s1941_s17, %s1618_s27  ;;  %p1623_p12 = scmp.lt.s32.totalorder %s1941_s17, %s2005_s5 }
 0x1f7   : > { %p1624_p13 = scmp.lt.s32.totalorder %s1622_s14, %s1618_s27 }
 0x1f8   : > { %p1620_p10 = pnand %p1619_p9, %p1782_p3 }
 0x1f9   : > { %p1625_p0 = por %p1624_p13, %p1623_p12 }
 0x1fa   : > { %p1621_p11 = pneg %p1620_p10 }
 0x1fc   : > { %p1626_p1 = pnand %p1625_p0, %p1621_p11 }
 0x1fe   : > { %1629 = shalt.err (!%p1626_p1)
}
 0x1ff   : > { %s1699_s22 = smov 64   ;;  %s1700_s30 = smov 4  }
 0x200   : > { %1504 = dma.vmem_to_hbm [thread:$0]  (%p1782_p3), %s1943_s16, 1024, %s1941_s17, %s1949_s26, %s1699_s22, %s1699_s22, %s1700_s30  }
 0x201 PF: > { %p1510_p2 = scmp.ge.s32.totalorder %s1696_s25, 2  ;;  %s1129_s8 = sand.u32 1, %s1668_s18  }
 0x202   : > { %s1130_s9 = scalar_lea.sflag [#allocation3], %s1129_s8 }
 0x203   : > { %p1507_p4 = pnand %p1510_p2, %p1791_p8 }
 0x205   : > { %p1508_p5 = pneg %p1507_p4 }
 0x207   : > { %1663 = dma.done.wait (%p1508_p5), %s1130_s9, 1024  }
 0x208   : > { %1665 = vsyncadd (%p1508_p5), %s1130_s9, 4294966272  ;;  %s18_s25 = sadd.s32 1, %s1696_s25   ;;  %s2008_s18 = smov %s1672_s19 }
 0x209   : > { %p15_p6 = scmp.ge.s32.totalorder %s18_s25, 6   ;;  %s2009_s19 = smov %s1676_s20 }
 0x20a   : > { %s2010_s20 = smov %s1800_s11  ;;  %s2011_s21 = smov %s1688_s23 }
 0x20b   : > { %s2012_s22 = smov %s1692_s24  ;;  %s2013_s23 = smov %s2016_s28 }
 0x20c   : > { %s2014_s24 = smov %s2020_s29  ;;  %17 = sbr.rel (!%p15_p6) target bundleno = 5 (0x5), region = 79 }
 0x211   :  { %1135 = vsyncpa [#allocation3], 1 }
 0x212   :  { %1137 = vsyncpa [#allocation3 + $0x1], 1 }

</bundles_post_ra>
